<compile_context>
chip_gen: v5e
topology: v5e:2x2
jax: 0.10.0
libtpu: 0.0.40
codegen_flags: <defaults>
</compile_context>

<pallas_src>
import functools

import jax
import jax.numpy as jnp
from jax import lax
from jax.experimental import pallas as pl
from jax.experimental.pallas import tpu as pltpu

EPS = 1e-5


# ----------------------------------------------------------------------------
# Pallas kernel: the full ConvTasNetModule for Bb samples per grid step.
# ----------------------------------------------------------------------------
def conv_tasnet_kernel(x_ref, w1pc_ref, w2b_ref, alpha_ref, o_ref, *,
                       cin, cout, t_len):
    ca, n = x_ref.shape            # Ca = round_up(Cin+1, 8);  N = Bb * T
    depth = w1pc_ref.shape[0]
    bb = n // t_len                # samples in this grid step

    xa = x_ref[...]                # resident f32 state [Ca, N]; row Cin == 1.0

    # ---- hoisted per-grid-step constants (layer-invariant) ------------------
    t_idx = lax.broadcasted_iota(jnp.int32, (1, n), 1)
    # position of each lane inside its own sample (no integer div/mod needed)
    t_w = t_idx
    for b in range(1, bb):
        t_w = t_w - (t_idx >= b * t_len).astype(jnp.int32) * t_len
    # per-sample segment masks for the GLayerNorm statistics
    seg = [((t_idx >= b * t_len) & (t_idx < (b + 1) * t_len)).astype(jnp.float32)
           for b in range(bb)]
    inv_n = 1.0 / float(cout * t_len)

    for i in range(depth):          # static unroll; dilation = 2**i
        d = 2 ** i
        blk = w1pc_ref[i]           # [R, Ca+7]: (w1|b1|0.., gamma, beta, wd0..2, bd, b2)
        w1 = blk[:cout, :ca]
        gamma = blk[:cout, ca + 0:ca + 1]
        beta = blk[:cout, ca + 1:ca + 2]
        wd0 = blk[:cout, ca + 2:ca + 3]
        wd1 = blk[:cout, ca + 3:ca + 4]
        wd2 = blk[:cout, ca + 4:ca + 5]
        bd = blk[:cout, ca + 5:ca + 6]
        b2 = blk[:ca, ca + 6:ca + 7]
        w2 = w2b_ref[i]             # [Ca, Cout]  (rows >= Cin are zero)
        a = alpha_ref[i]            # PReLU slope (shared by both activations)

        # pwConv1 (+ bias folded via the resident ones row) — bf16 MXU matmul
        h = jnp.dot(w1.astype(jnp.bfloat16), xa.astype(jnp.bfloat16),
                    preferred_element_type=jnp.float32)           # [Cout, N] f32
        h = jnp.where(h >= 0.0, h, a * h)                         # PReLU

        # GLayerNorm: per-sample global stats over (Cout, T), per-channel affine.
        # Channel reduction first (cheap sublane reduce); the remaining
        # per-sample lane reduction only touches a [1, N] row.
        s1 = jnp.sum(h, axis=0, keepdims=True)                    # [1, N]
        s2 = jnp.sum(h * h, axis=0, keepdims=True)                # [1, N]
        mean_row = jnp.zeros((1, n), jnp.float32)
        istd_row = jnp.zeros((1, n), jnp.float32)
        for b in range(bb):
            m = jnp.sum(s1 * seg[b], axis=1, keepdims=True) * inv_n       # [1,1]
            q = jnp.sum(s2 * seg[b], axis=1, keepdims=True) * inv_n
            v = jnp.maximum(q - m * m, 0.0)                               # clamp
            mean_row = mean_row + seg[b] * m
            istd_row = istd_row + seg[b] * lax.rsqrt(v + EPS)
        h = (h - mean_row) * istd_row * gamma + beta              # fused traversal

        # Depthwise dilated conv (k=3, 'same' padding):
        #   out[c,j] = wd0*h[c,j-d] + wd1*h[c,j] + wd2*h[c,j+d]  (zero outside
        #   each sample).  Neighbours via XLU rolls; boundary handling is a
        #   multiply by 0/1 row masks (cross-sample leakage is masked too).
        mask_l = (t_w >= d).astype(jnp.float32)                   # [1, N]
        mask_r = (t_w < t_len - d).astype(jnp.float32)            # [1, N]
        h_l = pltpu.roll(h, shift=d, axis=1) * mask_l
        h_r = pltpu.roll(h, shift=n - d, axis=1) * mask_r
        h = wd1 * h + wd0 * h_l + wd2 * h_r + bd
        h = jnp.where(h >= 0.0, h, a * h)                         # PReLU

        # pwConv2 back to Cin (+ residual).  Zero rows of w2/b2 keep the ones
        # row and the channel padding of the state intact.
        xa = xa + jnp.dot(w2.astype(jnp.bfloat16), h.astype(jnp.bfloat16),
                          preferred_element_type=jnp.float32) + b2

    o_ref[...] = xa


# ----------------------------------------------------------------------------
# Wrappers
# ----------------------------------------------------------------------------
def _pack_params(layer_params, cin, cout, ca):
    """Merge all per-layer tensors into one [depth, R, Ca+7] block + w2 + alpha."""
    r = max(cout, ca)
    w1pc, w2b, alpha = [], [], []
    for p in layer_params:
        w1 = jnp.concatenate([p["w1"], p["b1"]], axis=1)              # [Cout, Cin+1]
        w1 = jnp.pad(w1, ((0, r - cout), (0, ca - (cin + 1))))        # [R, Ca]
        pc6 = jnp.concatenate([p["gamma"], p["beta"], p["wd"], p["bd"]], axis=1)
        pc6 = jnp.pad(pc6, ((0, r - cout), (0, 0)))                   # [R, 6]
        b2 = jnp.pad(p["b2"], ((0, r - cin), (0, 0)))                 # [R, 1]
        w1pc.append(jnp.concatenate([w1, pc6, b2], axis=1))           # [R, Ca+7]
        w2b.append(jnp.pad(p["w2"], ((0, ca - cin), (0, 0))))         # [Ca, Cout]
        alpha.append(p["alpha"].reshape(()))
    return jnp.stack(w1pc), jnp.stack(w2b), jnp.stack(alpha)


def conv_tasnet_module(x, layer_params):
    B, Cin, T = x.shape
    depth = len(layer_params)
    Cout = layer_params[0]["w1"].shape[0]
    # roll-based 'same' depthwise conv assumes dilation < T
    assert 2 ** (depth - 1) < T, "dilation 2**(depth-1) must be smaller than T"

    Ca = ((Cin + 1 + 7) // 8) * 8                  # aligned contraction dim
    # batch multiple samples per grid step; keep >=2 steps for v7x megacore
    bb = B // 2 if (B % 2 == 0 and B >= 4) else 1
    n_blk = bb * T

    w1pc, w2b, alpha = _pack_params(layer_params, Cin, Cout, Ca)

    # lane-dense slab: [B, Cin, T] -> [Cin, B*T], plus ones row (folds b1) and
    # zero rows up to Ca (keeps the MXU contraction dim aligned to 8).
    x = x.astype(jnp.float32)
    x_flat = jnp.transpose(x, (1, 0, 2)).reshape(Cin, B * T)
    x_aug = jnp.concatenate(
        [x_flat,
         jnp.ones((1, B * T), jnp.float32),
         jnp.zeros((Ca - Cin - 1, B * T), jnp.float32)], axis=0)      # [Ca, B*T]

    kernel = functools.partial(conv_tasnet_kernel, cin=Cin, cout=Cout, t_len=T)

    out = pl.pallas_call(
        kernel,
        out_shape=jax.ShapeDtypeStruct((Ca, B * T), jnp.float32),
        grid=(B // bb,),
        in_specs=[
            pl.BlockSpec((Ca, n_blk), lambda b: (0, b)),
            pl.BlockSpec(w1pc.shape, lambda b: (0, 0, 0)),
            pl.BlockSpec(w2b.shape, lambda b: (0, 0, 0)),
            pl.BlockSpec(memory_space=pltpu.MemorySpace.SMEM),
        ],
        out_specs=pl.BlockSpec((Ca, n_blk), lambda b: (0, b)),
        input_output_aliases={0: 0},               # output aliases the x slab
        compiler_params=pltpu.CompilerParams(
            dimension_semantics=("parallel",),
            vmem_limit_bytes=32 * 1024 * 1024),
    )(x_aug, w1pc, w2b, alpha)

    return out[:Cin, :].reshape(Cin, B, T).transpose(1, 0, 2)


def init_params(key, in_channel, out_channel, depth):
    params = []
    for i in range(depth):
        ks = jax.random.split(jax.random.fold_in(key, i), 6)
        params.append({
            # pwConv1: weight [Cout, Cin, 1] -> stored [Cout, Cin]
            "w1": 0.1 * jax.random.normal(ks[0], (out_channel, in_channel), jnp.float32),
            "b1": 0.1 * jax.random.normal(ks[1], (out_channel, 1), jnp.float32),
            # PReLU: single shared parameter, PyTorch default init 0.25
            "alpha": jnp.full((1, 1), 0.25, jnp.float32),
            # GLayerNorm affine
            "gamma": jnp.ones((out_channel, 1), jnp.float32),
            "beta": jnp.zeros((out_channel, 1), jnp.float32),
            # dwConv: weight [Cout, 1, 3] -> stored [Cout, 3]
            "wd": 0.1 * jax.random.normal(ks[2], (out_channel, 3), jnp.float32),
            "bd": 0.1 * jax.random.normal(ks[3], (out_channel, 1), jnp.float32),
            # pwConv2: weight [Cin, Cout, 1] -> stored [Cin, Cout]
            "w2": 0.1 * jax.random.normal(ks[4], (in_channel, out_channel), jnp.float32),
            "b2": 0.1 * jax.random.normal(ks[5], (in_channel, 1), jnp.float32),
        })
    return params


# ----------------------------------------------------------------------------
# Pure-JAX reference (f32) for correctness check
# ----------------------------------------------------------------------------
def tconv_block_ref(x, p, dilation):
    alpha = p["alpha"][0, 0]
    h = jnp.einsum("oc,bct->bot", p["w1"], x) + p["b1"][None]
    h = jnp.where(h >= 0.0, h, alpha * h)
    mean = jnp.mean(h, axis=(1, 2), keepdims=True)
    var = jnp.mean((h - mean) ** 2, axis=(1, 2), keepdims=True)
    h = (h - mean) / jnp.sqrt(var + EPS) * p["gamma"][None] + p["beta"][None]
    T = x.shape[-1]
    hp = jnp.pad(h, ((0, 0), (0, 0), (dilation, dilation)))
    h = (p["wd"][None, :, 0:1] * hp[:, :, 0:T]
         + p["wd"][None, :, 1:2] * hp[:, :, dilation:dilation + T]
         + p["wd"][None, :, 2:3] * hp[:, :, 2 * dilation:2 * dilation + T]
         + p["bd"][None])
    h = jnp.where(h >= 0.0, h, alpha * h)
    y = jnp.einsum("co,bot->bct", p["w2"], h) + p["b2"][None]
    return x + y


def conv_tasnet_ref(x, layer_params):
    for i, p in enumerate(layer_params):
        x = tconv_block_ref(x, p, dilation=2 ** i)
    return x


if __name__ == "__main__":
    B, Cin, Cout, T, depth = 4, 8, 16, 128, 3
    key = jax.random.PRNGKey(0)
    kx, kp = jax.random.split(key)
    x = jax.random.normal(kx, (B, Cin, T), jnp.float32)
    params = init_params(kp, Cin, Cout, depth)

    run = jax.jit(conv_tasnet_module)
    y = jax.block_until_ready(run(x, params))

    y_ref = conv_tasnet_ref(x, params)
    assert y.shape == (B, Cin, T) and y.dtype == jnp.float32
    max_err = float(jnp.max(jnp.abs(y - y_ref)))
    # tolerance sized for bf16 MXU operands (elementwise math / accumulation in f32)
    if not max_err < 3e-2:
        raise AssertionError(f"mismatch vs reference: max abs err = {max_err}")
    print("KERNEL_OK")
</pallas_src>

<mosaic_0001>
module attributes {stable_mosaic.version = 11 : i64} {
  func.func @conv_tasnet_kernel(%arg0: i32, %arg1: memref<16x256xf32, #tpu.memory_space<vmem>>, %arg2: memref<3x16x23xf32, #tpu.memory_space<vmem>>, %arg3: memref<3x16x16xf32, #tpu.memory_space<vmem>>, %arg4: memref<3xf32, #tpu.memory_space<smem>>, %arg5: memref<16x256xf32, #tpu.memory_space<vmem>>) attributes {dimension_semantics = [#tpu.dimension_semantics<parallel>], iteration_bounds = array<i64: 2>, scalar_prefetch = 0 : i64, scratch_operands = 0 : i64, tpu.core_type = #tpu.core_type<tc>, window_params = [{transform_indices = @transform_0, window_bounds = array<i64: 16, 256>}, {pipeline_mode = #tpu.pipeline_mode<synchronous>, transform_indices = @transform_1, window_bounds = array<i64: 3, 16, 23>}, {pipeline_mode = #tpu.pipeline_mode<synchronous>, transform_indices = @transform_2, window_bounds = array<i64: 3, 16, 16>}, {transform_indices = @transform_3, window_bounds = array<i64: 3>}, {transform_indices = @transform_4, window_bounds = array<i64: 16, 256>}]} {
    %c0 = arith.constant 0 : index
    %c0_0 = arith.constant 0 : index
    %0 = vector.load %arg1[%c0, %c0_0] : memref<16x256xf32, #tpu.memory_space<vmem>>, vector<16x256xf32>
    %1 = tpu.iota {dimensions = array<i32: 1>} : vector<1x256xi32>
    %c128_i32 = arith.constant 128 : i32
    %2 = vector.broadcast %c128_i32 : i32 to vector<1x256xi32>
    %3 = arith.cmpi sge, %1, %2 : vector<1x256xi32>
    %4 = arith.extui %3 : vector<1x256xi1> to vector<1x256xi32>
    %c128_i32_1 = arith.constant 128 : i32
    %5 = vector.broadcast %c128_i32_1 : i32 to vector<1x256xi32>
    %6 = arith.muli %4, %5 : vector<1x256xi32>
    %7 = arith.subi %1, %6 : vector<1x256xi32>
    %c0_i32 = arith.constant 0 : i32
    %8 = vector.broadcast %c0_i32 : i32 to vector<1x256xi32>
    %9 = arith.cmpi sge, %1, %8 : vector<1x256xi32>
    %c128_i32_2 = arith.constant 128 : i32
    %10 = vector.broadcast %c128_i32_2 : i32 to vector<1x256xi32>
    %11 = arith.cmpi slt, %1, %10 : vector<1x256xi32>
    %12 = arith.andi %9, %11 : vector<1x256xi1>
    %13 = arith.extui %12 : vector<1x256xi1> to vector<1x256xi32>
    %14 = arith.sitofp %13 : vector<1x256xi32> to vector<1x256xf32>
    %c128_i32_3 = arith.constant 128 : i32
    %15 = vector.broadcast %c128_i32_3 : i32 to vector<1x256xi32>
    %16 = arith.cmpi sge, %1, %15 : vector<1x256xi32>
    %c256_i32 = arith.constant 256 : i32
    %17 = vector.broadcast %c256_i32 : i32 to vector<1x256xi32>
    %18 = arith.cmpi slt, %1, %17 : vector<1x256xi32>
    %19 = arith.andi %16, %18 : vector<1x256xi1>
    %20 = arith.extui %19 : vector<1x256xi1> to vector<1x256xi32>
    %21 = arith.sitofp %20 : vector<1x256xi32> to vector<1x256xf32>
    %c0_4 = arith.constant 0 : index
    %c0_5 = arith.constant 0 : index
    %c0_6 = arith.constant 0 : index
    %22 = vector.load %arg2[%c0_4, %c0_5, %c0_6] : memref<3x16x23xf32, #tpu.memory_space<vmem>>, vector<1x16x23xf32>
    %23 = vector.shape_cast %22 : vector<1x16x23xf32> to vector<16x23xf32>
    %24 = vector.extract_strided_slice %23 {offsets = [0, 0], sizes = [16, 16], strides = [1, 1]} : vector<16x23xf32> to vector<16x16xf32>
    %25 = vector.extract_strided_slice %23 {offsets = [0, 16], sizes = [16, 1], strides = [1, 1]} : vector<16x23xf32> to vector<16x1xf32>
    %26 = vector.extract_strided_slice %23 {offsets = [0, 17], sizes = [16, 1], strides = [1, 1]} : vector<16x23xf32> to vector<16x1xf32>
    %27 = vector.extract_strided_slice %23 {offsets = [0, 18], sizes = [16, 1], strides = [1, 1]} : vector<16x23xf32> to vector<16x1xf32>
    %28 = vector.extract_strided_slice %23 {offsets = [0, 19], sizes = [16, 1], strides = [1, 1]} : vector<16x23xf32> to vector<16x1xf32>
    %29 = vector.extract_strided_slice %23 {offsets = [0, 20], sizes = [16, 1], strides = [1, 1]} : vector<16x23xf32> to vector<16x1xf32>
    %30 = vector.extract_strided_slice %23 {offsets = [0, 21], sizes = [16, 1], strides = [1, 1]} : vector<16x23xf32> to vector<16x1xf32>
    %31 = vector.extract_strided_slice %23 {offsets = [0, 22], sizes = [16, 1], strides = [1, 1]} : vector<16x23xf32> to vector<16x1xf32>
    %c0_7 = arith.constant 0 : index
    %c0_8 = arith.constant 0 : index
    %c0_9 = arith.constant 0 : index
    %32 = vector.load %arg3[%c0_7, %c0_8, %c0_9] : memref<3x16x16xf32, #tpu.memory_space<vmem>>, vector<1x16x16xf32>
    %33 = vector.shape_cast %32 : vector<1x16x16xf32> to vector<16x16xf32>
    %c0_10 = arith.constant 0 : index
    %34 = memref.load %arg4[%c0_10] : memref<3xf32, #tpu.memory_space<smem>>
    %35 = arith.truncf %24 : vector<16x16xf32> to vector<16x16xbf16>
    %36 = arith.truncf %0 : vector<16x256xf32> to vector<16x256xbf16>
    %cst = arith.constant dense<0.000000e+00> : vector<16x256xf32>
    %37 = tpu.matmul %35, %36, %cst {dimension_numbers = #tpu.dot_dimension_numbers<[1], [0], [0], [1], [0, 0, 1, 1], [], []>} : vector<16x16xbf16>, vector<16x256xbf16>, vector<16x256xf32> -> vector<16x256xf32>
    %cst_11 = arith.constant 0.000000e+00 : f32
    %38 = vector.broadcast %cst_11 : f32 to vector<16x256xf32>
    %39 = arith.cmpf oge, %37, %38 : vector<16x256xf32>
    %40 = vector.broadcast %34 : f32 to vector<16x256xf32>
    %41 = arith.mulf %40, %37 : vector<16x256xf32>
    %42 = arith.select %39, %37, %41 : vector<16x256xi1>, vector<16x256xf32>
    %cst_12 = arith.constant dense<0.000000e+00> : vector<256xf32>
    %43 = vector.multi_reduction <add>, %42, %cst_12 [0] : vector<16x256xf32> to vector<256xf32>
    %44 = vector.shape_cast %43 : vector<256xf32> to vector<1x256xf32>
    %45 = arith.mulf %42, %42 : vector<16x256xf32>
    %cst_13 = arith.constant dense<0.000000e+00> : vector<256xf32>
    %46 = vector.multi_reduction <add>, %45, %cst_13 [0] : vector<16x256xf32> to vector<256xf32>
    %47 = vector.shape_cast %46 : vector<256xf32> to vector<1x256xf32>
    %cst_14 = arith.constant 0.000000e+00 : f32
    %48 = vector.broadcast %cst_14 : f32 to vector<1x256xf32>
    %cst_15 = arith.constant 0.000000e+00 : f32
    %49 = vector.broadcast %cst_15 : f32 to vector<1x256xf32>
    %50 = arith.mulf %44, %14 : vector<1x256xf32>
    %cst_16 = arith.constant dense<0.000000e+00> : vector<1xf32>
    %51 = vector.multi_reduction <add>, %50, %cst_16 [1] : vector<1x256xf32> to vector<1xf32>
    %52 = vector.shape_cast %51 : vector<1xf32> to vector<1x1xf32>
    %cst_17 = arith.constant 4.8828125E-4 : f32
    %53 = vector.broadcast %cst_17 : f32 to vector<1x1xf32>
    %54 = arith.mulf %52, %53 : vector<1x1xf32>
    %55 = arith.mulf %47, %14 : vector<1x256xf32>
    %cst_18 = arith.constant dense<0.000000e+00> : vector<1xf32>
    %56 = vector.multi_reduction <add>, %55, %cst_18 [1] : vector<1x256xf32> to vector<1xf32>
    %57 = vector.shape_cast %56 : vector<1xf32> to vector<1x1xf32>
    %cst_19 = arith.constant 4.8828125E-4 : f32
    %58 = vector.broadcast %cst_19 : f32 to vector<1x1xf32>
    %59 = arith.mulf %57, %58 : vector<1x1xf32>
    %60 = arith.mulf %54, %54 : vector<1x1xf32>
    %61 = arith.subf %59, %60 : vector<1x1xf32>
    %cst_20 = arith.constant 0.000000e+00 : f32
    %62 = vector.broadcast %cst_20 : f32 to vector<1x1xf32>
    %63 = arith.maximumf %61, %62 : vector<1x1xf32>
    %64 = vector.broadcast %54 : vector<1x1xf32> to vector<1x256xf32>
    %65 = arith.mulf %14, %64 : vector<1x256xf32>
    %66 = arith.addf %48, %65 : vector<1x256xf32>
    %cst_21 = arith.constant 9.99999974E-6 : f32
    %67 = vector.broadcast %cst_21 : f32 to vector<1x1xf32>
    %68 = arith.addf %63, %67 : vector<1x1xf32>
    %69 = math.rsqrt %68 : vector<1x1xf32>
    %70 = vector.broadcast %69 : vector<1x1xf32> to vector<1x256xf32>
    %71 = arith.mulf %14, %70 : vector<1x256xf32>
    %72 = arith.addf %49, %71 : vector<1x256xf32>
    %73 = arith.mulf %44, %21 : vector<1x256xf32>
    %cst_22 = arith.constant dense<0.000000e+00> : vector<1xf32>
    %74 = vector.multi_reduction <add>, %73, %cst_22 [1] : vector<1x256xf32> to vector<1xf32>
    %75 = vector.shape_cast %74 : vector<1xf32> to vector<1x1xf32>
    %cst_23 = arith.constant 4.8828125E-4 : f32
    %76 = vector.broadcast %cst_23 : f32 to vector<1x1xf32>
    %77 = arith.mulf %75, %76 : vector<1x1xf32>
    %78 = arith.mulf %47, %21 : vector<1x256xf32>
    %cst_24 = arith.constant dense<0.000000e+00> : vector<1xf32>
    %79 = vector.multi_reduction <add>, %78, %cst_24 [1] : vector<1x256xf32> to vector<1xf32>
    %80 = vector.shape_cast %79 : vector<1xf32> to vector<1x1xf32>
    %cst_25 = arith.constant 4.8828125E-4 : f32
    %81 = vector.broadcast %cst_25 : f32 to vector<1x1xf32>
    %82 = arith.mulf %80, %81 : vector<1x1xf32>
    %83 = arith.mulf %77, %77 : vector<1x1xf32>
    %84 = arith.subf %82, %83 : vector<1x1xf32>
    %cst_26 = arith.constant 0.000000e+00 : f32
    %85 = vector.broadcast %cst_26 : f32 to vector<1x1xf32>
    %86 = arith.maximumf %84, %85 : vector<1x1xf32>
    %87 = vector.broadcast %77 : vector<1x1xf32> to vector<1x256xf32>
    %88 = arith.mulf %21, %87 : vector<1x256xf32>
    %89 = arith.addf %66, %88 : vector<1x256xf32>
    %cst_27 = arith.constant 9.99999974E-6 : f32
    %90 = vector.broadcast %cst_27 : f32 to vector<1x1xf32>
    %91 = arith.addf %86, %90 : vector<1x1xf32>
    %92 = math.rsqrt %91 : vector<1x1xf32>
    %93 = vector.broadcast %92 : vector<1x1xf32> to vector<1x256xf32>
    %94 = arith.mulf %21, %93 : vector<1x256xf32>
    %95 = arith.addf %72, %94 : vector<1x256xf32>
    %96 = vector.broadcast %89 : vector<1x256xf32> to vector<16x256xf32>
    %97 = arith.subf %42, %96 : vector<16x256xf32>
    %98 = vector.broadcast %95 : vector<1x256xf32> to vector<16x256xf32>
    %99 = arith.mulf %97, %98 : vector<16x256xf32>
    %100 = vector.broadcast %25 : vector<16x1xf32> to vector<16x256xf32>
    %101 = arith.mulf %99, %100 : vector<16x256xf32>
    %102 = vector.broadcast %26 : vector<16x1xf32> to vector<16x256xf32>
    %103 = arith.addf %101, %102 : vector<16x256xf32>
    %c1_i32 = arith.constant 1 : i32
    %104 = vector.broadcast %c1_i32 : i32 to vector<1x256xi32>
    %105 = arith.cmpi sge, %7, %104 : vector<1x256xi32>
    %106 = arith.extui %105 : vector<1x256xi1> to vector<1x256xi32>
    %107 = arith.sitofp %106 : vector<1x256xi32> to vector<1x256xf32>
    %c127_i32 = arith.constant 127 : i32
    %108 = vector.broadcast %c127_i32 : i32 to vector<1x256xi32>
    %109 = arith.cmpi slt, %7, %108 : vector<1x256xi32>
    %110 = arith.extui %109 : vector<1x256xi1> to vector<1x256xi32>
    %111 = arith.sitofp %110 : vector<1x256xi32> to vector<1x256xf32>
    %c1_i32_28 = arith.constant 1 : i32
    %112 = tpu.dynamic_rotate %103 by %c1_i32_28 dim 1 : vector<16x256xf32>, i32 -> vector<16x256xf32>
    %113 = vector.broadcast %107 : vector<1x256xf32> to vector<16x256xf32>
    %114 = arith.mulf %112, %113 : vector<16x256xf32>
    %c255_i32 = arith.constant 255 : i32
    %115 = tpu.dynamic_rotate %103 by %c255_i32 dim 1 : vector<16x256xf32>, i32 -> vector<16x256xf32>
    %116 = vector.broadcast %111 : vector<1x256xf32> to vector<16x256xf32>
    %117 = arith.mulf %115, %116 : vector<16x256xf32>
    %118 = vector.broadcast %28 : vector<16x1xf32> to vector<16x256xf32>
    %119 = arith.mulf %118, %103 : vector<16x256xf32>
    %120 = vector.broadcast %27 : vector<16x1xf32> to vector<16x256xf32>
    %121 = arith.mulf %120, %114 : vector<16x256xf32>
    %122 = arith.addf %119, %121 : vector<16x256xf32>
    %123 = vector.broadcast %29 : vector<16x1xf32> to vector<16x256xf32>
    %124 = arith.mulf %123, %117 : vector<16x256xf32>
    %125 = arith.addf %122, %124 : vector<16x256xf32>
    %126 = vector.broadcast %30 : vector<16x1xf32> to vector<16x256xf32>
    %127 = arith.addf %125, %126 : vector<16x256xf32>
    %cst_29 = arith.constant 0.000000e+00 : f32
    %128 = vector.broadcast %cst_29 : f32 to vector<16x256xf32>
    %129 = arith.cmpf oge, %127, %128 : vector<16x256xf32>
    %130 = vector.broadcast %34 : f32 to vector<16x256xf32>
    %131 = arith.mulf %130, %127 : vector<16x256xf32>
    %132 = arith.select %129, %127, %131 : vector<16x256xi1>, vector<16x256xf32>
    %133 = arith.truncf %33 : vector<16x16xf32> to vector<16x16xbf16>
    %134 = arith.truncf %132 : vector<16x256xf32> to vector<16x256xbf16>
    %cst_30 = arith.constant dense<0.000000e+00> : vector<16x256xf32>
    %135 = tpu.matmul %133, %134, %cst_30 {dimension_numbers = #tpu.dot_dimension_numbers<[1], [0], [0], [1], [0, 0, 1, 1], [], []>} : vector<16x16xbf16>, vector<16x256xbf16>, vector<16x256xf32> -> vector<16x256xf32>
    %136 = arith.addf %0, %135 : vector<16x256xf32>
    %137 = vector.broadcast %31 : vector<16x1xf32> to vector<16x256xf32>
    %138 = arith.addf %136, %137 : vector<16x256xf32>
    %c1 = arith.constant 1 : index
    %c0_31 = arith.constant 0 : index
    %c0_32 = arith.constant 0 : index
    %139 = vector.load %arg2[%c1, %c0_31, %c0_32] : memref<3x16x23xf32, #tpu.memory_space<vmem>>, vector<1x16x23xf32>
    %140 = vector.shape_cast %139 : vector<1x16x23xf32> to vector<16x23xf32>
    %141 = vector.extract_strided_slice %140 {offsets = [0, 0], sizes = [16, 16], strides = [1, 1]} : vector<16x23xf32> to vector<16x16xf32>
    %142 = vector.extract_strided_slice %140 {offsets = [0, 16], sizes = [16, 1], strides = [1, 1]} : vector<16x23xf32> to vector<16x1xf32>
    %143 = vector.extract_strided_slice %140 {offsets = [0, 17], sizes = [16, 1], strides = [1, 1]} : vector<16x23xf32> to vector<16x1xf32>
    %144 = vector.extract_strided_slice %140 {offsets = [0, 18], sizes = [16, 1], strides = [1, 1]} : vector<16x23xf32> to vector<16x1xf32>
    %145 = vector.extract_strided_slice %140 {offsets = [0, 19], sizes = [16, 1], strides = [1, 1]} : vector<16x23xf32> to vector<16x1xf32>
    %146 = vector.extract_strided_slice %140 {offsets = [0, 20], sizes = [16, 1], strides = [1, 1]} : vector<16x23xf32> to vector<16x1xf32>
    %147 = vector.extract_strided_slice %140 {offsets = [0, 21], sizes = [16, 1], strides = [1, 1]} : vector<16x23xf32> to vector<16x1xf32>
    %148 = vector.extract_strided_slice %140 {offsets = [0, 22], sizes = [16, 1], strides = [1, 1]} : vector<16x23xf32> to vector<16x1xf32>
    %c1_33 = arith.constant 1 : index
    %c0_34 = arith.constant 0 : index
    %c0_35 = arith.constant 0 : index
    %149 = vector.load %arg3[%c1_33, %c0_34, %c0_35] : memref<3x16x16xf32, #tpu.memory_space<vmem>>, vector<1x16x16xf32>
    %150 = vector.shape_cast %149 : vector<1x16x16xf32> to vector<16x16xf32>
    %c1_36 = arith.constant 1 : index
    %151 = memref.load %arg4[%c1_36] : memref<3xf32, #tpu.memory_space<smem>>
    %152 = arith.truncf %141 : vector<16x16xf32> to vector<16x16xbf16>
    %153 = arith.truncf %138 : vector<16x256xf32> to vector<16x256xbf16>
    %cst_37 = arith.constant dense<0.000000e+00> : vector<16x256xf32>
    %154 = tpu.matmul %152, %153, %cst_37 {dimension_numbers = #tpu.dot_dimension_numbers<[1], [0], [0], [1], [0, 0, 1, 1], [], []>} : vector<16x16xbf16>, vector<16x256xbf16>, vector<16x256xf32> -> vector<16x256xf32>
    %cst_38 = arith.constant 0.000000e+00 : f32
    %155 = vector.broadcast %cst_38 : f32 to vector<16x256xf32>
    %156 = arith.cmpf oge, %154, %155 : vector<16x256xf32>
    %157 = vector.broadcast %151 : f32 to vector<16x256xf32>
    %158 = arith.mulf %157, %154 : vector<16x256xf32>
    %159 = arith.select %156, %154, %158 : vector<16x256xi1>, vector<16x256xf32>
    %cst_39 = arith.constant dense<0.000000e+00> : vector<256xf32>
    %160 = vector.multi_reduction <add>, %159, %cst_39 [0] : vector<16x256xf32> to vector<256xf32>
    %161 = vector.shape_cast %160 : vector<256xf32> to vector<1x256xf32>
    %162 = arith.mulf %159, %159 : vector<16x256xf32>
    %cst_40 = arith.constant dense<0.000000e+00> : vector<256xf32>
    %163 = vector.multi_reduction <add>, %162, %cst_40 [0] : vector<16x256xf32> to vector<256xf32>
    %164 = vector.shape_cast %163 : vector<256xf32> to vector<1x256xf32>
    %cst_41 = arith.constant 0.000000e+00 : f32
    %165 = vector.broadcast %cst_41 : f32 to vector<1x256xf32>
    %cst_42 = arith.constant 0.000000e+00 : f32
    %166 = vector.broadcast %cst_42 : f32 to vector<1x256xf32>
    %167 = arith.mulf %161, %14 : vector<1x256xf32>
    %cst_43 = arith.constant dense<0.000000e+00> : vector<1xf32>
    %168 = vector.multi_reduction <add>, %167, %cst_43 [1] : vector<1x256xf32> to vector<1xf32>
    %169 = vector.shape_cast %168 : vector<1xf32> to vector<1x1xf32>
    %cst_44 = arith.constant 4.8828125E-4 : f32
    %170 = vector.broadcast %cst_44 : f32 to vector<1x1xf32>
    %171 = arith.mulf %169, %170 : vector<1x1xf32>
    %172 = arith.mulf %164, %14 : vector<1x256xf32>
    %cst_45 = arith.constant dense<0.000000e+00> : vector<1xf32>
    %173 = vector.multi_reduction <add>, %172, %cst_45 [1] : vector<1x256xf32> to vector<1xf32>
    %174 = vector.shape_cast %173 : vector<1xf32> to vector<1x1xf32>
    %cst_46 = arith.constant 4.8828125E-4 : f32
    %175 = vector.broadcast %cst_46 : f32 to vector<1x1xf32>
    %176 = arith.mulf %174, %175 : vector<1x1xf32>
    %177 = arith.mulf %171, %171 : vector<1x1xf32>
    %178 = arith.subf %176, %177 : vector<1x1xf32>
    %cst_47 = arith.constant 0.000000e+00 : f32
    %179 = vector.broadcast %cst_47 : f32 to vector<1x1xf32>
    %180 = arith.maximumf %178, %179 : vector<1x1xf32>
    %181 = vector.broadcast %171 : vector<1x1xf32> to vector<1x256xf32>
    %182 = arith.mulf %14, %181 : vector<1x256xf32>
    %183 = arith.addf %165, %182 : vector<1x256xf32>
    %cst_48 = arith.constant 9.99999974E-6 : f32
    %184 = vector.broadcast %cst_48 : f32 to vector<1x1xf32>
    %185 = arith.addf %180, %184 : vector<1x1xf32>
    %186 = math.rsqrt %185 : vector<1x1xf32>
    %187 = vector.broadcast %186 : vector<1x1xf32> to vector<1x256xf32>
    %188 = arith.mulf %14, %187 : vector<1x256xf32>
    %189 = arith.addf %166, %188 : vector<1x256xf32>
    %190 = arith.mulf %161, %21 : vector<1x256xf32>
    %cst_49 = arith.constant dense<0.000000e+00> : vector<1xf32>
    %191 = vector.multi_reduction <add>, %190, %cst_49 [1] : vector<1x256xf32> to vector<1xf32>
    %192 = vector.shape_cast %191 : vector<1xf32> to vector<1x1xf32>
    %cst_50 = arith.constant 4.8828125E-4 : f32
    %193 = vector.broadcast %cst_50 : f32 to vector<1x1xf32>
    %194 = arith.mulf %192, %193 : vector<1x1xf32>
    %195 = arith.mulf %164, %21 : vector<1x256xf32>
    %cst_51 = arith.constant dense<0.000000e+00> : vector<1xf32>
    %196 = vector.multi_reduction <add>, %195, %cst_51 [1] : vector<1x256xf32> to vector<1xf32>
    %197 = vector.shape_cast %196 : vector<1xf32> to vector<1x1xf32>
    %cst_52 = arith.constant 4.8828125E-4 : f32
    %198 = vector.broadcast %cst_52 : f32 to vector<1x1xf32>
    %199 = arith.mulf %197, %198 : vector<1x1xf32>
    %200 = arith.mulf %194, %194 : vector<1x1xf32>
    %201 = arith.subf %199, %200 : vector<1x1xf32>
    %cst_53 = arith.constant 0.000000e+00 : f32
    %202 = vector.broadcast %cst_53 : f32 to vector<1x1xf32>
    %203 = arith.maximumf %201, %202 : vector<1x1xf32>
    %204 = vector.broadcast %194 : vector<1x1xf32> to vector<1x256xf32>
    %205 = arith.mulf %21, %204 : vector<1x256xf32>
    %206 = arith.addf %183, %205 : vector<1x256xf32>
    %cst_54 = arith.constant 9.99999974E-6 : f32
    %207 = vector.broadcast %cst_54 : f32 to vector<1x1xf32>
    %208 = arith.addf %203, %207 : vector<1x1xf32>
    %209 = math.rsqrt %208 : vector<1x1xf32>
    %210 = vector.broadcast %209 : vector<1x1xf32> to vector<1x256xf32>
    %211 = arith.mulf %21, %210 : vector<1x256xf32>
    %212 = arith.addf %189, %211 : vector<1x256xf32>
    %213 = vector.broadcast %206 : vector<1x256xf32> to vector<16x256xf32>
    %214 = arith.subf %159, %213 : vector<16x256xf32>
    %215 = vector.broadcast %212 : vector<1x256xf32> to vector<16x256xf32>
    %216 = arith.mulf %214, %215 : vector<16x256xf32>
    %217 = vector.broadcast %142 : vector<16x1xf32> to vector<16x256xf32>
    %218 = arith.mulf %216, %217 : vector<16x256xf32>
    %219 = vector.broadcast %143 : vector<16x1xf32> to vector<16x256xf32>
    %220 = arith.addf %218, %219 : vector<16x256xf32>
    %c2_i32 = arith.constant 2 : i32
    %221 = vector.broadcast %c2_i32 : i32 to vector<1x256xi32>
    %222 = arith.cmpi sge, %7, %221 : vector<1x256xi32>
    %223 = arith.extui %222 : vector<1x256xi1> to vector<1x256xi32>
    %224 = arith.sitofp %223 : vector<1x256xi32> to vector<1x256xf32>
    %c126_i32 = arith.constant 126 : i32
    %225 = vector.broadcast %c126_i32 : i32 to vector<1x256xi32>
    %226 = arith.cmpi slt, %7, %225 : vector<1x256xi32>
    %227 = arith.extui %226 : vector<1x256xi1> to vector<1x256xi32>
    %228 = arith.sitofp %227 : vector<1x256xi32> to vector<1x256xf32>
    %c2_i32_55 = arith.constant 2 : i32
    %229 = tpu.dynamic_rotate %220 by %c2_i32_55 dim 1 : vector<16x256xf32>, i32 -> vector<16x256xf32>
    %230 = vector.broadcast %224 : vector<1x256xf32> to vector<16x256xf32>
    %231 = arith.mulf %229, %230 : vector<16x256xf32>
    %c254_i32 = arith.constant 254 : i32
    %232 = tpu.dynamic_rotate %220 by %c254_i32 dim 1 : vector<16x256xf32>, i32 -> vector<16x256xf32>
    %233 = vector.broadcast %228 : vector<1x256xf32> to vector<16x256xf32>
    %234 = arith.mulf %232, %233 : vector<16x256xf32>
    %235 = vector.broadcast %145 : vector<16x1xf32> to vector<16x256xf32>
    %236 = arith.mulf %235, %220 : vector<16x256xf32>
    %237 = vector.broadcast %144 : vector<16x1xf32> to vector<16x256xf32>
    %238 = arith.mulf %237, %231 : vector<16x256xf32>
    %239 = arith.addf %236, %238 : vector<16x256xf32>
    %240 = vector.broadcast %146 : vector<16x1xf32> to vector<16x256xf32>
    %241 = arith.mulf %240, %234 : vector<16x256xf32>
    %242 = arith.addf %239, %241 : vector<16x256xf32>
    %243 = vector.broadcast %147 : vector<16x1xf32> to vector<16x256xf32>
    %244 = arith.addf %242, %243 : vector<16x256xf32>
    %cst_56 = arith.constant 0.000000e+00 : f32
    %245 = vector.broadcast %cst_56 : f32 to vector<16x256xf32>
    %246 = arith.cmpf oge, %244, %245 : vector<16x256xf32>
    %247 = vector.broadcast %151 : f32 to vector<16x256xf32>
    %248 = arith.mulf %247, %244 : vector<16x256xf32>
    %249 = arith.select %246, %244, %248 : vector<16x256xi1>, vector<16x256xf32>
    %250 = arith.truncf %150 : vector<16x16xf32> to vector<16x16xbf16>
    %251 = arith.truncf %249 : vector<16x256xf32> to vector<16x256xbf16>
    %cst_57 = arith.constant dense<0.000000e+00> : vector<16x256xf32>
    %252 = tpu.matmul %250, %251, %cst_57 {dimension_numbers = #tpu.dot_dimension_numbers<[1], [0], [0], [1], [0, 0, 1, 1], [], []>} : vector<16x16xbf16>, vector<16x256xbf16>, vector<16x256xf32> -> vector<16x256xf32>
    %253 = arith.addf %138, %252 : vector<16x256xf32>
    %254 = vector.broadcast %148 : vector<16x1xf32> to vector<16x256xf32>
    %255 = arith.addf %253, %254 : vector<16x256xf32>
    %c2 = arith.constant 2 : index
    %c0_58 = arith.constant 0 : index
    %c0_59 = arith.constant 0 : index
    %256 = vector.load %arg2[%c2, %c0_58, %c0_59] : memref<3x16x23xf32, #tpu.memory_space<vmem>>, vector<1x16x23xf32>
    %257 = vector.shape_cast %256 : vector<1x16x23xf32> to vector<16x23xf32>
    %258 = vector.extract_strided_slice %257 {offsets = [0, 0], sizes = [16, 16], strides = [1, 1]} : vector<16x23xf32> to vector<16x16xf32>
    %259 = vector.extract_strided_slice %257 {offsets = [0, 16], sizes = [16, 1], strides = [1, 1]} : vector<16x23xf32> to vector<16x1xf32>
    %260 = vector.extract_strided_slice %257 {offsets = [0, 17], sizes = [16, 1], strides = [1, 1]} : vector<16x23xf32> to vector<16x1xf32>
    %261 = vector.extract_strided_slice %257 {offsets = [0, 18], sizes = [16, 1], strides = [1, 1]} : vector<16x23xf32> to vector<16x1xf32>
    %262 = vector.extract_strided_slice %257 {offsets = [0, 19], sizes = [16, 1], strides = [1, 1]} : vector<16x23xf32> to vector<16x1xf32>
    %263 = vector.extract_strided_slice %257 {offsets = [0, 20], sizes = [16, 1], strides = [1, 1]} : vector<16x23xf32> to vector<16x1xf32>
    %264 = vector.extract_strided_slice %257 {offsets = [0, 21], sizes = [16, 1], strides = [1, 1]} : vector<16x23xf32> to vector<16x1xf32>
    %265 = vector.extract_strided_slice %257 {offsets = [0, 22], sizes = [16, 1], strides = [1, 1]} : vector<16x23xf32> to vector<16x1xf32>
    %c2_60 = arith.constant 2 : index
    %c0_61 = arith.constant 0 : index
    %c0_62 = arith.constant 0 : index
    %266 = vector.load %arg3[%c2_60, %c0_61, %c0_62] : memref<3x16x16xf32, #tpu.memory_space<vmem>>, vector<1x16x16xf32>
    %267 = vector.shape_cast %266 : vector<1x16x16xf32> to vector<16x16xf32>
    %c2_63 = arith.constant 2 : index
    %268 = memref.load %arg4[%c2_63] : memref<3xf32, #tpu.memory_space<smem>>
    %269 = arith.truncf %258 : vector<16x16xf32> to vector<16x16xbf16>
    %270 = arith.truncf %255 : vector<16x256xf32> to vector<16x256xbf16>
    %cst_64 = arith.constant dense<0.000000e+00> : vector<16x256xf32>
    %271 = tpu.matmul %269, %270, %cst_64 {dimension_numbers = #tpu.dot_dimension_numbers<[1], [0], [0], [1], [0, 0, 1, 1], [], []>} : vector<16x16xbf16>, vector<16x256xbf16>, vector<16x256xf32> -> vector<16x256xf32>
    %cst_65 = arith.constant 0.000000e+00 : f32
    %272 = vector.broadcast %cst_65 : f32 to vector<16x256xf32>
    %273 = arith.cmpf oge, %271, %272 : vector<16x256xf32>
    %274 = vector.broadcast %268 : f32 to vector<16x256xf32>
    %275 = arith.mulf %274, %271 : vector<16x256xf32>
    %276 = arith.select %273, %271, %275 : vector<16x256xi1>, vector<16x256xf32>
    %cst_66 = arith.constant dense<0.000000e+00> : vector<256xf32>
    %277 = vector.multi_reduction <add>, %276, %cst_66 [0] : vector<16x256xf32> to vector<256xf32>
    %278 = vector.shape_cast %277 : vector<256xf32> to vector<1x256xf32>
    %279 = arith.mulf %276, %276 : vector<16x256xf32>
    %cst_67 = arith.constant dense<0.000000e+00> : vector<256xf32>
    %280 = vector.multi_reduction <add>, %279, %cst_67 [0] : vector<16x256xf32> to vector<256xf32>
    %281 = vector.shape_cast %280 : vector<256xf32> to vector<1x256xf32>
    %cst_68 = arith.constant 0.000000e+00 : f32
    %282 = vector.broadcast %cst_68 : f32 to vector<1x256xf32>
    %cst_69 = arith.constant 0.000000e+00 : f32
    %283 = vector.broadcast %cst_69 : f32 to vector<1x256xf32>
    %284 = arith.mulf %278, %14 : vector<1x256xf32>
    %cst_70 = arith.constant dense<0.000000e+00> : vector<1xf32>
    %285 = vector.multi_reduction <add>, %284, %cst_70 [1] : vector<1x256xf32> to vector<1xf32>
    %286 = vector.shape_cast %285 : vector<1xf32> to vector<1x1xf32>
    %cst_71 = arith.constant 4.8828125E-4 : f32
    %287 = vector.broadcast %cst_71 : f32 to vector<1x1xf32>
    %288 = arith.mulf %286, %287 : vector<1x1xf32>
    %289 = arith.mulf %281, %14 : vector<1x256xf32>
    %cst_72 = arith.constant dense<0.000000e+00> : vector<1xf32>
    %290 = vector.multi_reduction <add>, %289, %cst_72 [1] : vector<1x256xf32> to vector<1xf32>
    %291 = vector.shape_cast %290 : vector<1xf32> to vector<1x1xf32>
    %cst_73 = arith.constant 4.8828125E-4 : f32
    %292 = vector.broadcast %cst_73 : f32 to vector<1x1xf32>
    %293 = arith.mulf %291, %292 : vector<1x1xf32>
    %294 = arith.mulf %288, %288 : vector<1x1xf32>
    %295 = arith.subf %293, %294 : vector<1x1xf32>
    %cst_74 = arith.constant 0.000000e+00 : f32
    %296 = vector.broadcast %cst_74 : f32 to vector<1x1xf32>
    %297 = arith.maximumf %295, %296 : vector<1x1xf32>
    %298 = vector.broadcast %288 : vector<1x1xf32> to vector<1x256xf32>
    %299 = arith.mulf %14, %298 : vector<1x256xf32>
    %300 = arith.addf %282, %299 : vector<1x256xf32>
    %cst_75 = arith.constant 9.99999974E-6 : f32
    %301 = vector.broadcast %cst_75 : f32 to vector<1x1xf32>
    %302 = arith.addf %297, %301 : vector<1x1xf32>
    %303 = math.rsqrt %302 : vector<1x1xf32>
    %304 = vector.broadcast %303 : vector<1x1xf32> to vector<1x256xf32>
    %305 = arith.mulf %14, %304 : vector<1x256xf32>
    %306 = arith.addf %283, %305 : vector<1x256xf32>
    %307 = arith.mulf %278, %21 : vector<1x256xf32>
    %cst_76 = arith.constant dense<0.000000e+00> : vector<1xf32>
    %308 = vector.multi_reduction <add>, %307, %cst_76 [1] : vector<1x256xf32> to vector<1xf32>
    %309 = vector.shape_cast %308 : vector<1xf32> to vector<1x1xf32>
    %cst_77 = arith.constant 4.8828125E-4 : f32
    %310 = vector.broadcast %cst_77 : f32 to vector<1x1xf32>
    %311 = arith.mulf %309, %310 : vector<1x1xf32>
    %312 = arith.mulf %281, %21 : vector<1x256xf32>
    %cst_78 = arith.constant dense<0.000000e+00> : vector<1xf32>
    %313 = vector.multi_reduction <add>, %312, %cst_78 [1] : vector<1x256xf32> to vector<1xf32>
    %314 = vector.shape_cast %313 : vector<1xf32> to vector<1x1xf32>
    %cst_79 = arith.constant 4.8828125E-4 : f32
    %315 = vector.broadcast %cst_79 : f32 to vector<1x1xf32>
    %316 = arith.mulf %314, %315 : vector<1x1xf32>
    %317 = arith.mulf %311, %311 : vector<1x1xf32>
    %318 = arith.subf %316, %317 : vector<1x1xf32>
    %cst_80 = arith.constant 0.000000e+00 : f32
    %319 = vector.broadcast %cst_80 : f32 to vector<1x1xf32>
    %320 = arith.maximumf %318, %319 : vector<1x1xf32>
    %321 = vector.broadcast %311 : vector<1x1xf32> to vector<1x256xf32>
    %322 = arith.mulf %21, %321 : vector<1x256xf32>
    %323 = arith.addf %300, %322 : vector<1x256xf32>
    %cst_81 = arith.constant 9.99999974E-6 : f32
    %324 = vector.broadcast %cst_81 : f32 to vector<1x1xf32>
    %325 = arith.addf %320, %324 : vector<1x1xf32>
    %326 = math.rsqrt %325 : vector<1x1xf32>
    %327 = vector.broadcast %326 : vector<1x1xf32> to vector<1x256xf32>
    %328 = arith.mulf %21, %327 : vector<1x256xf32>
    %329 = arith.addf %306, %328 : vector<1x256xf32>
    %330 = vector.broadcast %323 : vector<1x256xf32> to vector<16x256xf32>
    %331 = arith.subf %276, %330 : vector<16x256xf32>
    %332 = vector.broadcast %329 : vector<1x256xf32> to vector<16x256xf32>
    %333 = arith.mulf %331, %332 : vector<16x256xf32>
    %334 = vector.broadcast %259 : vector<16x1xf32> to vector<16x256xf32>
    %335 = arith.mulf %333, %334 : vector<16x256xf32>
    %336 = vector.broadcast %260 : vector<16x1xf32> to vector<16x256xf32>
    %337 = arith.addf %335, %336 : vector<16x256xf32>
    %c4_i32 = arith.constant 4 : i32
    %338 = vector.broadcast %c4_i32 : i32 to vector<1x256xi32>
    %339 = arith.cmpi sge, %7, %338 : vector<1x256xi32>
    %340 = arith.extui %339 : vector<1x256xi1> to vector<1x256xi32>
    %341 = arith.sitofp %340 : vector<1x256xi32> to vector<1x256xf32>
    %c124_i32 = arith.constant 124 : i32
    %342 = vector.broadcast %c124_i32 : i32 to vector<1x256xi32>
    %343 = arith.cmpi slt, %7, %342 : vector<1x256xi32>
    %344 = arith.extui %343 : vector<1x256xi1> to vector<1x256xi32>
    %345 = arith.sitofp %344 : vector<1x256xi32> to vector<1x256xf32>
    %c4_i32_82 = arith.constant 4 : i32
    %346 = tpu.dynamic_rotate %337 by %c4_i32_82 dim 1 : vector<16x256xf32>, i32 -> vector<16x256xf32>
    %347 = vector.broadcast %341 : vector<1x256xf32> to vector<16x256xf32>
    %348 = arith.mulf %346, %347 : vector<16x256xf32>
    %c252_i32 = arith.constant 252 : i32
    %349 = tpu.dynamic_rotate %337 by %c252_i32 dim 1 : vector<16x256xf32>, i32 -> vector<16x256xf32>
    %350 = vector.broadcast %345 : vector<1x256xf32> to vector<16x256xf32>
    %351 = arith.mulf %349, %350 : vector<16x256xf32>
    %352 = vector.broadcast %262 : vector<16x1xf32> to vector<16x256xf32>
    %353 = arith.mulf %352, %337 : vector<16x256xf32>
    %354 = vector.broadcast %261 : vector<16x1xf32> to vector<16x256xf32>
    %355 = arith.mulf %354, %348 : vector<16x256xf32>
    %356 = arith.addf %353, %355 : vector<16x256xf32>
    %357 = vector.broadcast %263 : vector<16x1xf32> to vector<16x256xf32>
    %358 = arith.mulf %357, %351 : vector<16x256xf32>
    %359 = arith.addf %356, %358 : vector<16x256xf32>
    %360 = vector.broadcast %264 : vector<16x1xf32> to vector<16x256xf32>
    %361 = arith.addf %359, %360 : vector<16x256xf32>
    %cst_83 = arith.constant 0.000000e+00 : f32
    %362 = vector.broadcast %cst_83 : f32 to vector<16x256xf32>
    %363 = arith.cmpf oge, %361, %362 : vector<16x256xf32>
    %364 = vector.broadcast %268 : f32 to vector<16x256xf32>
    %365 = arith.mulf %364, %361 : vector<16x256xf32>
    %366 = arith.select %363, %361, %365 : vector<16x256xi1>, vector<16x256xf32>
    %367 = arith.truncf %267 : vector<16x16xf32> to vector<16x16xbf16>
    %368 = arith.truncf %366 : vector<16x256xf32> to vector<16x256xbf16>
    %cst_84 = arith.constant dense<0.000000e+00> : vector<16x256xf32>
    %369 = tpu.matmul %367, %368, %cst_84 {dimension_numbers = #tpu.dot_dimension_numbers<[1], [0], [0], [1], [0, 0, 1, 1], [], []>} : vector<16x16xbf16>, vector<16x256xbf16>, vector<16x256xf32> -> vector<16x256xf32>
    %370 = arith.addf %255, %369 : vector<16x256xf32>
    %371 = vector.broadcast %265 : vector<16x1xf32> to vector<16x256xf32>
    %372 = arith.addf %370, %371 : vector<16x256xf32>
    %c0_85 = arith.constant 0 : index
    %c0_86 = arith.constant 0 : index
    %373 = vector.load %arg5[%c0_85, %c0_86] : memref<16x256xf32, #tpu.memory_space<vmem>>, vector<16x256xf32>
    tpu.vector_store %arg5[%c0_85, %c0_86], %372 {strides = array<i32>} : memref<16x256xf32, #tpu.memory_space<vmem>>, vector<16x256xf32>,
    return
  }
  func.func @transform_0(%arg0: i32) -> (i32, i32) {
    %c0_i32 = arith.constant 0 : i32
    %c0_i32_0 = arith.constant 0 : i32
    return %c0_i32, %arg0 : i32, i32
  }
  func.func @transform_1(%arg0: i32) -> (i32, i32, i32) {
    %c0_i32 = arith.constant 0 : i32
    %c0_i32_0 = arith.constant 0 : i32
    %c0_i32_1 = arith.constant 0 : i32
    %c0_i32_2 = arith.constant 0 : i32
    return %c0_i32, %c0_i32_0, %c0_i32_1 : i32, i32, i32
  }
  func.func @transform_2(%arg0: i32) -> (i32, i32, i32) {
    %c0_i32 = arith.constant 0 : i32
    %c0_i32_0 = arith.constant 0 : i32
    %c0_i32_1 = arith.constant 0 : i32
    %c0_i32_2 = arith.constant 0 : i32
    return %c0_i32, %c0_i32_0, %c0_i32_1 : i32, i32, i32
  }
  func.func @transform_3(%arg0: i32) -> i32 {
    %c0_i32 = arith.constant 0 : i32
    %c0_i32_0 = arith.constant 0 : i32
    return %c0_i32 : i32
  }
  func.func @transform_4(%arg0: i32) -> (i32, i32) {
    %c0_i32 = arith.constant 0 : i32
    %c0_i32_0 = arith.constant 0 : i32
    return %c0_i32, %arg0 : i32, i32
  }
}

</mosaic_0001>

<bundles_post_ra>
// kernel: conv_tasnet_module.1
= control target key start
LH: loop header
LB: loop body
LE: loop exit
PB: predicated region body
PF: predicated region fallthrough
CT: control target
= control target key end

     0   :  { %9 = vsyncpa [#allocation4], 0  ;;  %s1668_s15 = smov 0   ;;  %s1670_s16 = smov 0   ;;  %s2172_s0 = inlined_call_operand.vmem [shape: f32[16,512], index: 0, kind: input, shape index: {}, may-alias: {0,4}]   ;;  %s2173_s1 = inlined_call_operand.vmem [shape: f32[3,16,23], index: 1, kind: input, shape index: {}]   ;;  %s2174_s2 = inlined_call_operand.vmem [shape: f32[3,16,16], index: 2, kind: input, shape index: {}]   ;;  %s2175_s3 = inlined_call_operand.vmem [shape: f32[3], index: 3, kind: input, shape index: {}]   ;;  %s2176_s4 = inlined_call_operand.vmem [shape: f32[16,512], index: 4, kind: output, shape index: {}, may-alias: {0,4}]  }
   0x1   :  { %s1672_s17 = smov 0  }
   0x2 LB: > { %s1684_s18 = sadd.s32 4294967295, %s1626_s17   ;;  %s1687_s19 = sadd.s32 1, %s1626_s17   ;;  %s1626_s17 = sphi %s1672_s17, %s2182_s17   ;;  %s1622_s16 = sphi %s1670_s16, %s2181_s16   ;;  %s1618_s15 = sphi %s1668_s15, %s2180_s15  }
   0x3   : > { %s19_s20 = ssub.s32 %s1626_s17, %s1687_s19  ;;  %s22_s21 = sadd.s32 1, %s1622_s16 }
   0x4   : > { %p20_p0 = scmp.eq.s32.totalorder %s19_s20, 0  ;;  %p29_p1 = scmp.ne.s32.totalorder %s1622_s16, %s1618_s15 }
   0x5   : > { %p30_p2 = scmp.eq.s32.totalorder %s1626_s17, 0  ;;  %p122_p3 = scmp.eq.s32.totalorder %s1684_s18, 1 }
   0x6   : > { %s1697_s22 = scalar_select %p20_p0, %s1622_s16, %s22_s21  }
   0x7   : > { %p1699_p4 = por %p30_p2, %p29_p1  ;;  %p1703_p5 = por %p122_p3, %p29_p1 }
   0x8   : > { %p1430_p6 = scmp.ge.s32.totalorder %s1626_s17, 1  ;;  %p135_p7 = scmp.lt.s32.totalorder %s1626_s17, 3 }
   0x9   : > { %p1490_p8 = scmp.eq.s32.totalorder %s1684_s18, 0  ;;  %s153_s28 = sshll.u32 %s2175_s3, 4  ;;  %s154_s28 = int_to_ptr.vmem [resolvable:$true] %s153_s28 }
   0xa   : > { %p1710_p9 = pnand %p1430_p6, %p135_p7  ;;  %s1628_s29 = smov [#allocation3]  }
   0xb   : > { %p1432_p12 = scmp.ge.s32.totalorder %s1626_s17, 2 }
   0xc   : > { %p1486_p10 = pneg %p1710_p9 }
   0xd   : > { %160 = sbr.rel (%p1432_p12) target bundleno = 26 (0x1a), region = 28 }
   0xe   : > { %p1487_p11 = pnand %p1490_p8, %p1486_p10 }
  0x10   : > { %1489 = dma.vmem_to_smem (!%p1487_p11), %s154_s28, 16, %s1628_s29, [#allocation4]  }
  0x12   : > { %163 = sbr.rel (!%p1699_p4) target bundleno = 26 (0x1a), region = 32  ;;  %s165_s30 = sand.u32 (%p1699_p4), 1, %s1622_s16  }
  0x13   : > { %s1480_s5 = sshll.u32 (%p1699_p4), %s1626_s17, 4  ;;  %s1433_s6 = sshll.u32 (%p1699_p4), %s165_s30, 5 }
  0x14   : > { %s170_s9 = scalar_lea.vmem (%p1699_p4), %s2172_s0, %s1480_s5  ;;  %s167_s10 = scalar_lea.vmem (%p1699_p4), [#allocation2], %s1433_s6 }
  0x15   : > { %v183_v0 = vld [vmem:[%s170_s9] sm:$0xff] (%p1699_p4)  ;;  %v185_v1 = vld [vmem:[%s170_s9 + $0x8] sm:$0xff] (%p1699_p4) }
  0x16   : > { %v187_v2 = vld [vmem:[%s170_s9 + $0x20] sm:$0xff] (%p1699_p4)  ;;  %184 = vst [vmem:[%s167_s10] sm:$0xff] (%p1699_p4), %v183_v0  ;;  %v189_v3 = vld [vmem:[%s170_s9 + $0x28] sm:$0xff] (%p1699_p4) }
  0x17   : > { %186 = vst [vmem:[%s167_s10 + $0x8] sm:$0xff] %v185_v1 }
  0x18   : > { %188 = vst [vmem:[%s167_s10 + $0x10] sm:$0xff] %v187_v2 }
  0x19   : > { %190 = vst [vmem:[%s167_s10 + $0x18] sm:$0xff] %v189_v3 }
  0x1a PF: > { %199 = sbr.rel (%p1710_p9) target bundleno = 1883 (0x75b), region = 55  ;;  %s202_s11 = sand.u32 (!%p1710_p9), 1, %s1618_s15  }
  0x1b   : > { %s1732_s12 = sshll.u32 (!%p1710_p9), %s202_s11, 5 }
  0x1c   : > { %s204_s13 = scalar_lea.vmem (!%p1710_p9), [#allocation2], %s1732_s12 }
  0x1f   : > { %1613 = dma.done.wait (%p1490_p8), [#allocation4], 16  }
  0x20   : > { %1615 = vsyncadd (%p1490_p8), [#allocation4], 4294967280 }
  0x21   : > { %213 = sfence }
  0x22   : > { %v1739_v4 = vld [vmem:[%s204_s13] sm:$0xff]  ;;  %v1741_v5 = vld [vmem:[%s204_s13 + $0x10] sm:$0xff]  ;;  %v1743_v6 = vld [vmem:[%s204_s13 + $0x8] sm:$0xff]  ;;  %vm276_vm0 = vcmask 130048   ;;  %s272_s21 = sld [smem:[#allocation3]]  ;;  %v1629_v24 = vmov 17  }
  0x23   : > { %v274_v7 = vpack.c.bf16 %v1741_v5, %v1739_v4  ;;  %v1747_v8 = vld [vmem:[%s204_s13 + $0x18] sm:$0xff]  ;;  %v1752_v9 = vld [vmem:[%s2173_s1] sm:$0xff]  ;;  %v1757_v10 = vld [vmem:[%s2173_s1 + $0x8] sm:$0xff]  ;;  %1533 = vset.pattern.permute.xlu1 %v1629_v24  ;;  %1532 = vset.pattern.permute.xlu0 %v1629_v24  ;;  %v1630_v3 = vmov 16   ;;  %s1635_s23 = smov 127   ;;  %s1636_s25 = smov 1  }
  0x24   : > { %v275_v11 = vpack.c.bf16 %v1747_v8, %v1743_v6  ;;  %v273_v12 = vpack.c.bf16 %v1757_v10, %v1752_v9  ;;  %1531 = vset.pattern.permute.xlu2 %v1630_v3  ;;  %s1453_s8 = sld [smem:[#allocation3 + $0x1]]  ;;  %s1639_s9 = smov 126  }
  0x25   : > { %287 = vmatpush.bf16.msra.mxu0 %v274_v7  ;;  %431 = vperm.xlu2 %1531, %v1752_v9   ;;  %v1631_v7 = vmov 19   ;;  %s1640_s10 = smov 2   ;;  %s1641_s26 = smov 124  }
  0x26   : > { %301 = vmatpush.bf16.msra.mxu1 %v275_v11  ;;  %s1642_s27 = smov 4   ;;  %s231_s6 = scalar_lea.vmem [#allocation5], %s1732_s12 }
  0x27   : > { %s1481_s7 = sshll.u32 (%p1703_p5), %s1684_s18, 4 }
  0x28   : > { %1441 = vmatmul.msk.bf16.vlgmr.msra.gmra.mxu0 %vm276_vm0, %v273_v12  ;;  %v1765_v15 = vstv %s272_s21 }
  0x29   : > { %1442 = vmatmul.msk.bf16.vlgmr.msra.gmra.mxu1 %vm276_vm0, %v273_v12 }
  0x2d   : > { %436 = vperm.xlu2 %1531, %v1757_v10  }
  0x35   : > { %1534 = vset.pattern.permute.xlu2 %v1631_v7 }
  0x36   : > { %502 = vperm.xlu2 %1534, %v1752_v9  }
  0xa5   : > { %v289_v13 = vpop.f32.mrf.mxu0 }
  0xa6   : > { %v303_v14 = vpop.f32.mrf.mxu1  ;;  %v313_v16 = vmul.f32 %v1765_v15, %v289_v13  ;;  %vm308_vm1 = vcmp.ge.f32.partialorder %v289_v13, 0.0 }
  0xa7   : > { %v314_v17 = vmul.f32 %v1765_v15, %v303_v14  ;;  %vm309_vm2 = vcmp.ge.f32.partialorder %v303_v14, 0.0 }
  0xa8   : > { %v1769_v19 = vsel %vm308_vm1, %v289_v13, %v313_v16 }
  0xa9   : > { %v1772_v22 = vsel %vm309_vm2, %v303_v14, %v314_v17  ;;  %v335_v26 = vmul.f32 %v1769_v19, %v1769_v19 }
  0xaa   : > { %v336_v30 = vmul.f32 %v1772_v22, %v1772_v22 }
  0xad   : > { %v291_v18 = vpop.f32.mrf.mxu0 }
  0xae   : > { %vm310_vm3 = vcmp.ge.f32.partialorder %v291_v18, 0.0  ;;  %v315_v20 = vmul.f32 %v1765_v15, %v291_v18  ;;  %v305_v21 = vpop.f32.mrf.mxu1 }
  0xaf   : > { %vm311_vm4 = vcmp.ge.f32.partialorder %v305_v21, 0.0  ;;  %v316_v23 = vmul.f32 %v1765_v15, %v305_v21 }
  0xb0   : > { %v1777_v25 = vsel %vm310_vm3, %v291_v18, %v315_v20  ;;  %v1632_v18 = vmov 18  }
  0xb1   : > { %v321_v27 = vadd.f32 %v1777_v25, %v1769_v19  ;;  %v337_v28 = vmul.f32 %v1777_v25, %v1777_v25  ;;  %v1785_v29 = vsel %vm311_vm4, %v305_v21, %v316_v23  ;;  %1537 = vset.pattern.permute.xlu2 %v1632_v18  ;;  %v1633_v21 = vmov 20  }
  0xb2   : > { %v328_v31 = vadd.f32 %v1785_v29, %v1772_v22  ;;  %v338_v32 = vmul.f32 %v1785_v29, %v1785_v29  ;;  %518 = vperm.xlu2 %1537, %v1757_v10  }
  0xb3   : > { %v322_v33 = vrot.slane %v321_v27, 4  ;;  %v339_v34 = vadd.f32 %v337_v28, %v335_v26 }
  0xb4   : > { %v329_v35 = vrot.slane %v328_v31, 4  ;;  %v346_v36 = vadd.f32 %v338_v32, %v336_v30 }
  0xb5   : > { %v323_v37 = vadd.f32 %v322_v33, %v321_v27  ;;  %v340_v38 = vrot.slane %v339_v34, 4 }
  0xb6   : > { %v330_v39 = vadd.f32 %v329_v35, %v328_v31  ;;  %v347_v40 = vrot.slane %v346_v36, 4 }
  0xb7   : > { %v324_v41 = vrot.slane %v323_v37, 2  ;;  %v341_v42 = vadd.f32 %v340_v38, %v339_v34 }
  0xb8   : > { %v331_v43 = vrot.slane %v330_v39, 2  ;;  %v348_v44 = vadd.f32 %v347_v40, %v346_v36  ;;  %v1634_v40 = vmov 21  }
  0xb9   : > { %v325_v45 = vadd.f32 %v324_v41, %v323_v37  ;;  %v342_v46 = vrot.slane %v341_v42, 2 }
  0xba   : > { %v332_v47 = vadd.f32 %v331_v43, %v330_v39  ;;  %v349_v48 = vrot.slane %v348_v44, 2  ;;  %1539 = vset.pattern.permute.xlu2 %v1633_v21 }
  0xbb   : > { %v343_v49 = vadd.f32 %v342_v46, %v341_v42  ;;  %v326_v50 = vrot.slane %v325_v45, 1  ;;  %v432_v46 = vpop.permute.xlu2 %431 }
  0xbc   : > { %v333_v51 = vrot.slane %v332_v47, 1  ;;  %v350_v52 = vadd.f32 %v349_v48, %v348_v44 }
  0xbd   : > { %v344_v54 = vrot.slane %v343_v49, 1  ;;  %v327_v56 = vadd.f32 %v326_v50, %v325_v45 }
  0xbe   : > { %v334_v53 = vadd.f32 %v333_v51, %v332_v47  ;;  %v351_v55 = vrot.slane %v350_v52, 1 }
  0xbf   : > { %v345_v60 = vadd.f32 %v344_v54, %v343_v49  ;;  %v387_v63 = vmul.f32 0.0, %v327_v56 }
  0xc0   : > { %v354_v57 = vmul.f32 0.0, %v334_v53  ;;  %v352_v58 = vadd.f32 %v351_v55, %v350_v52 }
  0xc1   : > { %v393_v0 = vmul.f32 0.0, %v345_v60  ;;  %v389_v1 = vadd.f32 %v387_v63, %v334_v53 }
  0xc2   : > { %v355_v59 = vadd.f32 %v354_v57, %v327_v56  ;;  %v360_v61 = vmul.f32 0.0, %v352_v58 }
  0xc3   : > { %v395_v2 = vadd.f32 %v393_v0, %v352_v58 }
  0xc4   : > { %356 = vadd.xlane.f32.xlu0 %v355_v59  ;;  %v361_v62 = vadd.f32 %v360_v61, %v345_v60 }
  0xc6   : > { %362 = vadd.xlane.f32.xlu1 %v361_v62  ;;  %v437_v62 = vpop.permute.xlu2 %436 }
  0xcc   : > { %390 = vadd.xlane.f32.xlu0 %v389_v1 }
  0xce   : > { %396 = vadd.xlane.f32.xlu1 %v395_v2 }
  0xe0   : > { %444 = vperm.xlu0 %1532, %v1752_v9  }
  0xe7   : > { %448 = vperm.xlu1 %1533, %v1757_v10  }
  0xe8   : > { %1536 = vset.pattern.permute.xlu0 %v1632_v18 }
  0xe9   : > { %514 = vperm.xlu0 %1536, %v1752_v9  }
  0xef   : > { %1535 = vset.pattern.permute.xlu1 %v1631_v7 }
  0xf0   : > { %506 = vperm.xlu1 %1535, %v1757_v10  }
  0xf1   : > { %1541 = vset.pattern.permute.xlu0 %v1634_v40 }
  0xf8   : > { %1538 = vset.pattern.permute.xlu1 %v1633_v21 }
  0xf9   : > { %530 = vperm.xlu1 %1538, %v1752_v9  }
 0x101   : > { %1540 = vset.pattern.permute.xlu1 %v1634_v40 }
 0x137   : > { %v357_v11 = vpop.xlane.xlu0 %356 }
 0x138   : > { %v358_v12 = vmul.f32 0.00048828125, %v357_v11 }
 0x139   : > { %v363_v13 = vpop.xlane.xlu1 %362 }
 0x13a   : > { %v364_v14 = vmul.f32 0.00048828125, %v363_v13  ;;  %v365_v16 = vmul.f32 %v358_v12, %v358_v12  ;;  %v369_v47 = vmul.f32 0.0, %v358_v12 }
 0x13c   : > { %v366_v17 = vsub.f32 %v364_v14, %v365_v16 }
 0x13e   : > { %v367_v20 = vmax.f32 %v366_v17, 0.0 }
 0x13f   : > { %v391_v23 = vpop.xlane.xlu0 %390 }
 0x140   : > { %v372_v26 = vadd.f32 1e-05, %v367_v20  ;;  %v392_v27 = vmul.f32 0.00048828125, %v391_v23 }
 0x141   : > { %v397_v28 = vpop.xlane.xlu1 %396 }
 0x142   : > { %1573 = vrsqrt.f32 %v372_v26  ;;  %v398_v30 = vmul.f32 0.00048828125, %v397_v28  ;;  %v399_v31 = vmul.f32 %v392_v27, %v392_v27  ;;  %vm379_vm6 = vweird.f32 %v372_v26 }
 0x143   : > { %v402_v48 = vmul.f32 0.0, %v392_v27  ;;  %v405_v51 = vadd.f32 %v392_v27, %v369_v47  ;;  %v239_v28 = vlaneseq }
 0x144   : > { %v400_v32 = vsub.f32 %v398_v30, %v399_v31 }
 0x145   : > { %v404_v53 = vadd.f32 %v402_v48, %v358_v12  ;;  %v424_v58 = vsub.f32 %v1785_v29, %v405_v51  ;;  %v422_v2 = vsub.f32 %v1772_v22, %v405_v51 }
 0x146   : > { %v401_v33 = vmax.f32 %v400_v32, 0.0  ;;  %v1827_v32 = vand.u32 127, %v239_v28 }
 0x147   : > { %v421_v60 = vsub.f32 %v1769_v19, %v404_v53  ;;  %v423_v12 = vsub.f32 %v1777_v25, %v404_v53  ;;  %v503_v25 = vpop.permute.xlu2 %502 }
 0x148   : > { %v1574_v34 = vpop.eup %1573  ;;  %v406_v36 = vadd.f32 1e-05, %v401_v33  ;;  %v241_v33 = vadd.s32 128, %v1827_v32  ;;  %vm455_vm11 = vcmp.ge.s32.totalorder %v1827_v32, 1  ;;  %vm475_vm13 = vcmp.lt.s32.totalorder %v1827_v32, 1 }
 0x149   : > { %v374_v35 = vmul.f32 %v1574_v34, %v372_v26  ;;  %vm380_vm5 = vweird.f32 %v1574_v34  ;;  %vm461_vm14 = vcmp.lt.s32.totalorder %v1827_v32, 127 }
 0x14a   : > { %1575 = vrsqrt.f32 %v406_v36  ;;  %vm381_vm7 = vmor %vm379_vm6, %vm380_vm5  ;;  %vm413_vm9 = vweird.f32 %v406_v36 }
 0x14b   : > { %v375_v37 = vmul.f32 %v1574_v34, %v374_v35 }
 0x14d   : > { %v376_v38 = vmul.f32 0.5, %v375_v37 }
 0x14f   : > { %v377_v39 = vsub.f32 1.5, %v376_v38  ;;  %v519_v26 = vpop.permute.xlu2 %518  ;;  %v1637_v38 = vmov 0.0  }
 0x150   : > { %v1576_v41 = vpop.eup %1575  ;;  %v1445_v51 = vsel %vm461_vm14, 1.0, %v1637_v38 }
 0x151   : > { %v408_v42 = vmul.f32 %v1576_v41, %v406_v36  ;;  %v378_v44 = vmul.f32 %v1574_v34, %v377_v39  ;;  %vm414_vm8 = vweird.f32 %v1576_v41  ;;  %v1830_v36 = vadd.s32 4294967168, %v241_v33 }
 0x152   : > { %vm415_vm10 = vmor %vm413_vm9, %vm414_vm8  ;;  %v445_v14 = vpop.permute.xlu0 %444  ;;  %v1443_v39 = vsel %vm455_vm11, 1.0, %v1637_v38 }
 0x153   : > { %v409_v43 = vmul.f32 %v1576_v41, %v408_v42  ;;  %v382_v50 = vsel %vm381_vm7, %v1574_v34, %v378_v44  ;;  %vm456_vm12 = vcmp.ge.s32.totalorder %v1830_v36, 1  ;;  %vm462_vm15 = vcmp.lt.s32.totalorder %v1830_v36, 127 }
 0x154   : > { %v384_v54 = vmul.f32 0.0, %v382_v50 }
 0x155   : > { %v410_v45 = vmul.f32 0.5, %v409_v43 }
 0x157   : > { %v411_v49 = vsub.f32 1.5, %v410_v45 }
 0x159   : > { %v412_v52 = vmul.f32 %v1576_v41, %v411_v49  ;;  %v449_v1 = vpop.permute.xlu1 %448 }
 0x15b   : > { %v416_v55 = vsel %vm415_vm10, %v1576_v41, %v412_v52  ;;  %v515_v37 = vpop.permute.xlu0 %514  ;;  %v1444_v41 = vsel %vm456_vm12, 1.0, %v1637_v38 }
 0x15c   : > { %v417_v56 = vmul.f32 0.0, %v416_v55  ;;  %v420_v57 = vadd.f32 %v416_v55, %v384_v54 }
 0x15e   : > { %v419_v59 = vadd.f32 %v417_v56, %v382_v50  ;;  %v428_v61 = vmul.f32 %v424_v58, %v420_v57  ;;  %v426_v16 = vmul.f32 %v422_v2, %v420_v57 }
 0x160   : > { %v425_v63 = vmul.f32 %v421_v60, %v419_v59  ;;  %v442_v0 = vmul.f32 %v437_v62, %v428_v61  ;;  %v427_v17 = vmul.f32 %v423_v12, %v419_v59  ;;  %v440_v19 = vmul.f32 %v432_v46, %v426_v16 }
 0x162   : > { %v439_v11 = vmul.f32 %v432_v46, %v425_v63  ;;  %v1815_v13 = vadd.f32 %v449_v1, %v442_v0  ;;  %v441_v29 = vmul.f32 %v437_v62, %v427_v17  ;;  %v452_v22 = vadd.f32 %v445_v14, %v440_v19  ;;  %v507_v30 = vpop.permute.xlu1 %506 }
 0x163   : > { %v1638_v46 = vmov 22  }
 0x164   : > { %v451_v20 = vadd.f32 %v445_v14, %v439_v11  ;;  %490 = vrot.lane.b32.xlu0 %v1815_v13, %s1635_s23  ;;  %v1818_v23 = vadd.f32 %v449_v1, %v441_v29  ;;  %v510_v58 = vmul.f32 %v503_v25, %v452_v22  ;;  %v512_v19 = vmul.f32 %v507_v30, %v1815_v13 }
 0x166   : > { %484 = vrot.lane.b32.xlu1 %v451_v20, %s1635_s23  ;;  %467 = vrot.lane.b32.xlu2 %v451_v20, %s1636_s25  ;;  %v509_v57 = vmul.f32 %v503_v25, %v451_v20  ;;  %v511_v20 = vmul.f32 %v507_v30, %v1818_v23 }
 0x16b   : > { %v531_v34 = vpop.permute.xlu1 %530 }
 0x16c   : > { %550 = vperm.xlu0 %1541, %v1757_v10  }
 0x16e   : > { %488 = vrot.lane.b32.xlu1 %v452_v22, %s1635_s23  ;;  %469 = vrot.lane.b32.xlu2 %v1818_v23, %s1636_s25 }
 0x174   : > { %1546 = vset.pattern.permute.xlu0 %v1629_v24 }
 0x176   : > { %546 = vperm.xlu1 %1540, %v1752_v9   ;;  %471 = vrot.lane.b32.xlu2 %v452_v22, %s1636_s25 }
 0x17e   : > { %473 = vrot.lane.b32.xlu2 %v1815_v13, %s1636_s25  ;;  %1543 = vset.pattern.permute.xlu1 %v1638_v46  ;;  %s1466_s25 = sld [smem:[#allocation3 + $0x2]] }
 0x17f   : > { %612 = vperm.xlu1 %1543, %v1757_v10  }
 0x186   : > { %486 = vrot.lane.b32.xlu2 %v1818_v23, %s1635_s23 }
 0x187   : > { %1544 = vset.pattern.permute.xlu1 %v1630_v3 }
 0x18e   : > { %534 = vperm.xlu2 %1539, %v1757_v10   ;;  %v1446_v10 = vsel %vm462_vm15, 1.0, %v1637_v38  ;;  %vm807_vm15 = vcmp.ge.s32.totalorder %v1827_v32, 2 }
 0x196   : > { %1542 = vset.pattern.permute.xlu2 %v1638_v46 }
 0x197   : > { %608 = vperm.xlu2 %1542, %v1752_v9  }
 0x19f   : > { %1545 = vset.pattern.permute.xlu2 %v1630_v3 }
 0x1c0   : > { %v468_v27 = vpop.permute.xlu2 %467 }
 0x1c8   : > { %v470_v31 = vpop.permute.xlu2 %469 }
 0x1d0   : > { %v472_v35 = vpop.permute.xlu2 %471 }
 0x1d1   : > { %v476_v42 = vsel %vm475_vm13, %v468_v27, %v472_v35  ;;  %v478_v43 = vsel %vm475_vm13, %v472_v35, %v468_v27 }
 0x1d2   : > { %v480_v47 = vmul.f32 %v1443_v39, %v478_v43  ;;  %v481_v48 = vmul.f32 %v1444_v41, %v476_v42 }
 0x1d4   : > { %v521_v52 = vmul.f32 %v515_v37, %v480_v47  ;;  %v522_v9 = vmul.f32 %v515_v37, %v481_v48  ;;  %v270_v48 = vld [vmem:[%s2174_s2] sm:$0xff] }
 0x1d6   : > { %v491_v61 = vpop.permute.xlu0 %490  ;;  %v525_v2 = vadd.f32 %v521_v52, %v509_v57  ;;  %v526_v11 = vadd.f32 %v522_v9, %v510_v58 }
 0x1d8   : > { %v485_v44 = vpop.permute.xlu1 %484  ;;  %v474_v45 = vpop.permute.xlu2 %473 }
 0x1d9   : > { %v477_v49 = vsel %vm475_vm13, %v470_v31, %v474_v45  ;;  %v479_v50 = vsel %vm475_vm13, %v474_v45, %v470_v31 }
 0x1da   : > { %v482_v53 = vmul.f32 %v1443_v39, %v479_v50  ;;  %v483_v54 = vmul.f32 %v1444_v41, %v477_v49  ;;  %v271_v49 = vld [vmem:[%s2174_s2 + $0x8] sm:$0xff] }
 0x1dc   : > { %v523_v0 = vmul.f32 %v519_v26, %v482_v53  ;;  %v524_v1 = vmul.f32 %v519_v26, %v483_v54  ;;  %v569_v54 = vpack.c.bf16 %v271_v49, %v270_v48 }
 0x1de   : > { %v527_v31 = vadd.f32 %v523_v0, %v511_v20  ;;  %v528_v33 = vadd.f32 %v524_v1, %v512_v19  ;;  %v551_v41 = vpop.permute.xlu0 %550 }
 0x1e0   : > { %v489_v55 = vpop.permute.xlu1 %488  ;;  %v487_v56 = vpop.permute.xlu2 %486 }
 0x1e1   : > { %v493_v59 = vsel %vm461_vm14, %v485_v44, %v489_v55  ;;  %v495_v60 = vsel %vm461_vm14, %v489_v55, %v485_v44  ;;  %v494_v16 = vsel %vm461_vm14, %v487_v56, %v491_v61  ;;  %v496_v17 = vsel %vm461_vm14, %v491_v61, %v487_v56  ;;  %v1887_v55 = vld [vmem:[%s2173_s1 + $0x18] sm:$0xff] }
 0x1e2   : > { %v497_v62 = vmul.f32 %v1445_v51, %v493_v59  ;;  %v498_v63 = vmul.f32 %v1446_v10, %v495_v60  ;;  %v499_v25 = vmul.f32 %v1445_v51, %v494_v16  ;;  %v500_v27 = vmul.f32 %v1446_v10, %v496_v17  ;;  %788 = vperm.xlu2 %1545, %v1887_v55  }
 0x1e3   : > { %v1913_v17 = vstv %s1453_s8 }
 0x1e4   : > { %v537_v12 = vmul.f32 %v531_v34, %v497_v62  ;;  %v538_v14 = vmul.f32 %v531_v34, %v498_v63 }
 0x1e6   : > { %v541_v29 = vadd.f32 %v537_v12, %v525_v2  ;;  %v542_v22 = vadd.f32 %v538_v14, %v526_v11 }
 0x1e8   : > { %v547_v28 = vpop.permute.xlu1 %546  ;;  %v535_v26 = vpop.permute.xlu2 %534 }
 0x1e9   : > { %v553_v35 = vadd.f32 %v547_v28, %v541_v29  ;;  %v554_v34 = vadd.f32 %v547_v28, %v542_v22  ;;  %v539_v37 = vmul.f32 %v535_v26, %v499_v25  ;;  %v540_v39 = vmul.f32 %v535_v26, %v500_v27 }
 0x1ea   : > { %1550 = vset.pattern.permute.xlu2 %v1632_v18 }
 0x1eb   : > { %v543_v42 = vadd.f32 %v539_v37, %v527_v31  ;;  %v544_v43 = vadd.f32 %v540_v39, %v528_v33  ;;  %v561_v23 = vmul.f32 %v553_v35, %v1765_v15  ;;  %v562_v13 = vmul.f32 %v554_v34, %v1765_v15 }
 0x1ec   : > { %vm557_vm1 = vcmp.ge.f32.partialorder %v553_v35, 0.0  ;;  %vm558_vm2 = vcmp.ge.f32.partialorder %v554_v34, 0.0 }
 0x1ed   : > { %v555_v44 = vadd.f32 %v551_v41, %v543_v42  ;;  %v556_v45 = vadd.f32 %v551_v41, %v544_v43  ;;  %v565_v50 = vsel %vm557_vm1, %v553_v35, %v561_v23  ;;  %v566_v10 = vsel %vm558_vm2, %v554_v34, %v562_v13 }
 0x1ee   : > { %vm808_vm1 = vcmp.ge.s32.totalorder %v1830_v36, 2  ;;  %vm813_vm2 = vcmp.lt.s32.totalorder %v1827_v32, 126 }
 0x1ef   : > { %vm559_vm3 = vcmp.ge.f32.partialorder %v555_v44, 0.0  ;;  %v563_v30 = vmul.f32 %v555_v44, %v1765_v15  ;;  %vm560_vm4 = vcmp.ge.f32.partialorder %v556_v45, 0.0  ;;  %v564_v47 = vmul.f32 %v556_v45, %v1765_v15  ;;  %v1882_v15 = vld [vmem:[%s2173_s1 + $0x10] sm:$0xff] }
 0x1f0   : > { %783 = vperm.xlu1 %1544, %v1882_v15   ;;  %v626_v16 = vpack.c.bf16 %v1887_v55, %v1882_v15 }
 0x1f1   : > { %v567_v51 = vsel %vm559_vm3, %v555_v44, %v563_v30  ;;  %v568_v52 = vsel %vm560_vm4, %v556_v45, %v564_v47  ;;  %v609_v60 = vpop.permute.xlu2 %608  ;;  %v613_v61 = vpop.permute.xlu1 %612  ;;  %vm814_vm3 = vcmp.lt.s32.totalorder %v1830_v36, 126  ;;  %vm827_vm4 = vcmp.lt.s32.totalorder %v1827_v32, 2 }
 0x1f2   : > { %v570_v9 = vpack.c.bf16 %v567_v51, %v565_v50  ;;  %v571_v53 = vpack.c.bf16 %v568_v52, %v566_v10 }
 0x1f4   : > { %582 = vmatpush.bf16.msra.mxu2 %v570_v9  ;;  %596 = vmatpush.bf16.msra.mxu3 %v571_v53 }
 0x1f7   : > { %1447 = vmatmul.msk.bf16.vlgmr.msra.gmra.mxu2 %vm276_vm0, %v569_v54  ;;  %1448 = vmatmul.msk.bf16.vlgmr.msra.gmra.mxu3 %vm276_vm0, %v569_v54 }
 0x1f8   : > { %1547 = vset.pattern.permute.xlu1 %v1629_v24 }
 0x27a   : > { %v584_v56 = vpop.f32.mrf.mxu2  ;;  %v598_v57 = vpop.f32.mrf.mxu3 }
 0x27b   : > { %v603_v58 = vadd.f32 %v584_v56, %v1739_v4  ;;  %v604_v59 = vadd.f32 %v598_v57, %v1743_v6 }
 0x27d   : > { %v1897_v2 = vadd.f32 %v609_v60, %v603_v58  ;;  %v1899_v11 = vadd.f32 %v609_v60, %v604_v59 }
 0x282   : > { %v586_v62 = vpop.f32.mrf.mxu2  ;;  %v600_v63 = vpop.f32.mrf.mxu3 }
 0x283   : > { %v605_v0 = vadd.f32 %v586_v62, %v1741_v5  ;;  %v606_v1 = vadd.f32 %v600_v63, %v1747_v8 }
 0x285   : > { %v1901_v12 = vadd.f32 %v613_v61, %v605_v0  ;;  %v1903_v14 = vadd.f32 %v613_v61, %v606_v1 }
 0x287   : > { %v627_v4 = vpack.c.bf16 %v1901_v12, %v1897_v2  ;;  %v628_v6 = vpack.c.bf16 %v1903_v14, %v1899_v11 }
 0x289   : > { %639 = vmatpush.bf16.msrb.mxu0 %v627_v4  ;;  %653 = vmatpush.bf16.msrb.mxu1 %v628_v6 }
 0x28c   : > { %1454 = vmatmul.msk.bf16.vlgmr.msrb.gmra.mxu0 %vm276_vm0, %v626_v16  ;;  %1455 = vmatmul.msk.bf16.vlgmr.msrb.gmra.mxu1 %vm276_vm0, %v626_v16 }
 0x309   : > { %v641_v5 = vpop.f32.mrf.mxu0  ;;  %v655_v8 = vpop.f32.mrf.mxu1 }
 0x30a   : > { %v665_v20 = vmul.f32 %v1913_v17, %v641_v5  ;;  %v666_v19 = vmul.f32 %v1913_v17, %v655_v8  ;;  %vm660_vm5 = vcmp.ge.f32.partialorder %v641_v5, 0.0  ;;  %vm661_vm6 = vcmp.ge.f32.partialorder %v655_v8, 0.0 }
 0x30c   : > { %v1917_v29 = vsel %vm660_vm5, %v641_v5, %v665_v20  ;;  %v1919_v22 = vsel %vm661_vm6, %v655_v8, %v666_v19 }
 0x30d   : > { %v687_v31 = vmul.f32 %v1917_v29, %v1917_v29  ;;  %v688_v33 = vmul.f32 %v1919_v22, %v1919_v22 }
 0x311   : > { %v643_v25 = vpop.f32.mrf.mxu0  ;;  %v657_v27 = vpop.f32.mrf.mxu1 }
 0x312   : > { %vm662_vm7 = vcmp.ge.f32.partialorder %v643_v25, 0.0  ;;  %v667_v28 = vmul.f32 %v1913_v17, %v643_v25  ;;  %vm663_vm8 = vcmp.ge.f32.partialorder %v657_v27, 0.0  ;;  %v668_v26 = vmul.f32 %v1913_v17, %v657_v27 }
 0x314   : > { %v1927_v35 = vsel %vm662_vm7, %v643_v25, %v667_v28  ;;  %v1929_v34 = vsel %vm663_vm8, %v657_v27, %v668_v26  ;;  %v1953_v27 = vpop.permute.xlu2 %788  ;;  %v1955_v28 = vpop.permute.xlu1 %783 }
 0x315   : > { %v673_v37 = vadd.f32 %v1927_v35, %v1917_v29  ;;  %v689_v39 = vmul.f32 %v1927_v35, %v1927_v35  ;;  %v680_v41 = vadd.f32 %v1929_v34, %v1919_v22  ;;  %v690_v42 = vmul.f32 %v1929_v34, %v1929_v34 }
 0x317   : > { %v674_v43 = vrot.slane %v673_v37, 4  ;;  %v691_v44 = vadd.f32 %v689_v39, %v687_v31  ;;  %v681_v45 = vrot.slane %v680_v41, 4  ;;  %v698_v23 = vadd.f32 %v690_v42, %v688_v33 }
 0x319   : > { %v675_v13 = vadd.f32 %v674_v43, %v673_v37  ;;  %v699_v30 = vrot.slane %v698_v23, 4  ;;  %v682_v47 = vadd.f32 %v681_v45, %v680_v41  ;;  %v692_v48 = vrot.slane %v691_v44, 4 }
 0x31b   : > { %v676_v49 = vrot.slane %v675_v13, 2  ;;  %v683_v50 = vrot.slane %v682_v47, 2  ;;  %v693_v51 = vadd.f32 %v692_v48, %v691_v44  ;;  %v700_v10 = vadd.f32 %v699_v30, %v698_v23 }
 0x31d   : > { %v677_v52 = vadd.f32 %v676_v49, %v675_v13  ;;  %v684_v9 = vadd.f32 %v683_v50, %v682_v47  ;;  %v694_v53 = vrot.slane %v693_v51, 2  ;;  %v701_v54 = vrot.slane %v700_v10, 2 }
 0x31f   : > { %v678_v56 = vrot.slane %v677_v52, 1  ;;  %v685_v57 = vrot.slane %v684_v9, 1  ;;  %v695_v58 = vadd.f32 %v694_v53, %v693_v51  ;;  %v702_v59 = vadd.f32 %v701_v54, %v700_v10 }
 0x321   : > { %v679_v60 = vadd.f32 %v678_v56, %v677_v52  ;;  %v686_v61 = vadd.f32 %v685_v57, %v684_v9  ;;  %v696_v62 = vrot.slane %v695_v58, 1  ;;  %v703_v63 = vrot.slane %v702_v59, 1 }
 0x323   : > { %v739_v0 = vmul.f32 0.0, %v679_v60  ;;  %v706_v1 = vmul.f32 0.0, %v686_v61  ;;  %v704_v4 = vadd.f32 %v703_v63, %v702_v59  ;;  %v697_v5 = vadd.f32 %v696_v62, %v695_v58 }
 0x325   : > { %v741_v6 = vadd.f32 %v739_v0, %v686_v61  ;;  %v707_v16 = vadd.f32 %v706_v1, %v679_v60  ;;  %v712_v8 = vmul.f32 0.0, %v704_v4  ;;  %v745_v19 = vmul.f32 0.0, %v697_v5 }
 0x327   : > { %742 = vadd.xlane.f32.xlu1 %v741_v6  ;;  %708 = vadd.xlane.f32.xlu2 %v707_v16  ;;  %v713_v20 = vadd.f32 %v712_v8, %v697_v5  ;;  %v747_v25 = vadd.f32 %v745_v19, %v704_v4 }
 0x329   : > { %714 = vadd.xlane.f32.xlu0 %v713_v20 }
 0x32f   : > { %748 = vadd.xlane.f32.xlu2 %v747_v25 }
 0x33d   : > { %796 = vperm.xlu0 %1546, %v1882_v15  }
 0x340   : > { %800 = vperm.xlu1 %1547, %v1887_v55  }
 0x345   : > { %1548 = vset.pattern.permute.xlu0 %v1631_v7 }
 0x346   : > { %854 = vperm.xlu0 %1548, %v1882_v15  }
 0x347   : > { %866 = vperm.xlu2 %1550, %v1882_v15  }
 0x348   : > { %1549 = vset.pattern.permute.xlu1 %v1631_v7 }
 0x349   : > { %858 = vperm.xlu1 %1549, %v1887_v55  }
 0x34e   : > { %1553 = vset.pattern.permute.xlu0 %v1633_v21 }
 0x34f   : > { %1552 = vset.pattern.permute.xlu2 %v1633_v21 }
 0x350   : > { %882 = vperm.xlu2 %1552, %v1882_v15  }
 0x351   : > { %1551 = vset.pattern.permute.xlu1 %v1632_v18 }
 0x352   : > { %870 = vperm.xlu1 %1551, %v1887_v55  }
 0x358   : > { %1555 = vset.pattern.permute.xlu2 %v1634_v40 }
 0x35a   : > { %1554 = vset.pattern.permute.xlu1 %v1634_v40 }
 0x39a   : > { %v709_v26 = vpop.xlane.xlu2 %708  ;;  %v743_v33 = vpop.xlane.xlu1 %742 }
 0x39b   : > { %v710_v31 = vmul.f32 0.00048828125, %v709_v26  ;;  %v744_v42 = vmul.f32 0.00048828125, %v743_v33 }
 0x39c   : > { %v715_v37 = vpop.xlane.xlu0 %714 }
 0x39d   : > { %v716_v39 = vmul.f32 0.00048828125, %v715_v37  ;;  %v717_v41 = vmul.f32 %v710_v31, %v710_v31  ;;  %v751_v13 = vmul.f32 %v744_v42, %v744_v42  ;;  %v754_v58 = vmul.f32 0.0, %v744_v42 }
 0x39e   : > { %v721_v61 = vmul.f32 0.0, %v710_v31 }
 0x39f   : > { %v718_v43 = vsub.f32 %v716_v39, %v717_v41  ;;  %v756_v63 = vadd.f32 %v754_v58, %v710_v31 }
 0x3a0   : > { %v757_v6 = vadd.f32 %v744_v42, %v721_v61 }
 0x3a1   : > { %v719_v44 = vmax.f32 %v718_v43, 0.0  ;;  %v773_v16 = vsub.f32 %v1917_v29, %v756_v63  ;;  %v775_v5 = vsub.f32 %v1927_v35, %v756_v63 }
 0x3a2   : > { %v749_v45 = vpop.xlane.xlu2 %748  ;;  %v776_v37 = vsub.f32 %v1929_v34, %v757_v6  ;;  %v774_v41 = vsub.f32 %v1919_v22, %v757_v6 }
 0x3a3   : > { %v724_v23 = vadd.f32 1e-05, %v719_v44  ;;  %v750_v30 = vmul.f32 0.00048828125, %v749_v45 }
 0x3a5   : > { %1577 = vrsqrt.f32 %v724_v23  ;;  %v752_v47 = vsub.f32 %v750_v30, %v751_v13  ;;  %vm731_vm11 = vweird.f32 %v724_v23 }
 0x3a7   : > { %v753_v48 = vmax.f32 %v752_v47, 0.0 }
 0x3a9   : > { %v758_v49 = vadd.f32 1e-05, %v753_v48 }
 0x3aa   : > { %v867_v22 = vpop.permute.xlu2 %866 }
 0x3ab   : > { %v1578_v50 = vpop.eup %1577  ;;  %1579 = vrsqrt.f32 %v758_v49  ;;  %vm765_vm13 = vweird.f32 %v758_v49 }
 0x3ac   : > { %v726_v51 = vmul.f32 %v1578_v50, %v724_v23  ;;  %vm732_vm9 = vweird.f32 %v1578_v50 }
 0x3ad   : > { %vm733_vm12 = vmor %vm731_vm11, %vm732_vm9 }
 0x3ae   : > { %v727_v10 = vmul.f32 %v1578_v50, %v726_v51 }
 0x3af   : > { %v797_v39 = vpop.permute.xlu0 %796 }
 0x3b0   : > { %v728_v52 = vmul.f32 0.5, %v727_v10 }
 0x3b1   : > { %v1580_v9 = vpop.eup %1579 }
 0x3b2   : > { %v760_v53 = vmul.f32 %v1580_v9, %v758_v49  ;;  %v729_v54 = vsub.f32 1.5, %v728_v52  ;;  %vm766_vm10 = vweird.f32 %v1580_v9  ;;  %v801_v43 = vpop.permute.xlu1 %800  ;;  %v1458_v52 = vsel %vm813_vm2, 1.0, %v1637_v38 }
 0x3b3   : > { %vm767_vm14 = vmor %vm765_vm13, %vm766_vm10 }
 0x3b4   : > { %v761_v56 = vmul.f32 %v1580_v9, %v760_v53  ;;  %v730_v59 = vmul.f32 %v1578_v50, %v729_v54 }
 0x3b6   : > { %v762_v57 = vmul.f32 0.5, %v761_v56  ;;  %v734_v0 = vsel %vm733_vm12, %v1578_v50, %v730_v59 }
 0x3b7   : > { %v736_v8 = vmul.f32 0.0, %v734_v0 }
 0x3b8   : > { %v763_v60 = vsub.f32 1.5, %v762_v57  ;;  %v855_v49 = vpop.permute.xlu0 %854 }
 0x3ba   : > { %v764_v62 = vmul.f32 %v1580_v9, %v763_v60 }
 0x3bb   : > { %v859_v30 = vpop.permute.xlu1 %858 }
 0x3bc   : > { %v768_v1 = vsel %vm767_vm14, %v1580_v9, %v764_v62  ;;  %v1459_v9 = vsel %vm814_vm3, 1.0, %v1637_v38 }
 0x3bd   : > { %v769_v4 = vmul.f32 0.0, %v768_v1  ;;  %v772_v19 = vadd.f32 %v768_v1, %v736_v8 }
 0x3bf   : > { %v771_v20 = vadd.f32 %v769_v4, %v734_v0  ;;  %v780_v29 = vmul.f32 %v776_v37, %v772_v19  ;;  %v778_v35 = vmul.f32 %v774_v41, %v772_v19 }
 0x3c1   : > { %v777_v25 = vmul.f32 %v773_v16, %v771_v20  ;;  %v779_v26 = vmul.f32 %v775_v5, %v771_v20  ;;  %v794_v45 = vmul.f32 %v1953_v27, %v780_v29  ;;  %v792_v34 = vmul.f32 %v1955_v28, %v778_v35 }
 0x3c3   : > { %v791_v33 = vmul.f32 %v1955_v28, %v777_v25  ;;  %v793_v31 = vmul.f32 %v1953_v27, %v779_v26  ;;  %v806_v23 = vadd.f32 %v801_v43, %v794_v45  ;;  %v1968_v13 = vadd.f32 %v797_v39, %v792_v34  ;;  %v883_v27 = vpop.permute.xlu2 %882 }
 0x3c4   : > { %v871_v48 = vpop.permute.xlu1 %870 }
 0x3c5   : > { %v1963_v42 = vadd.f32 %v797_v39, %v791_v33  ;;  %v805_v44 = vadd.f32 %v801_v43, %v793_v31  ;;  %v864_v0 = vmul.f32 %v859_v30, %v806_v23  ;;  %v862_v45 = vmul.f32 %v855_v49, %v1968_v13 }
 0x3c7   : > { %838 = vrot.lane.b32.xlu0 %v805_v44, %s1639_s9  ;;  %821 = vrot.lane.b32.xlu1 %v805_v44, %s1640_s10  ;;  %v863_v63 = vmul.f32 %v859_v30, %v805_v44  ;;  %v861_v35 = vmul.f32 %v855_v49, %v1963_v42 }
 0x3c8   : > { %819 = vrot.lane.b32.xlu2 %v1963_v42, %s1640_s10 }
 0x3cf   : > { %886 = vperm.xlu0 %1553, %v1887_v55   ;;  %825 = vrot.lane.b32.xlu1 %v806_v23, %s1640_s10 }
 0x3d0   : > { %823 = vrot.lane.b32.xlu2 %v1968_v13, %s1640_s10 }
 0x3d7   : > { %840 = vrot.lane.b32.xlu1 %v1968_v13, %s1639_s9  ;;  %1560 = vset.pattern.permute.xlu0 %v1629_v24 }
 0x3d8   : > { %836 = vrot.lane.b32.xlu2 %v1963_v42, %s1639_s9 }
 0x3df   : > { %898 = vperm.xlu1 %1554, %v1882_v15  }
 0x3e0   : > { %842 = vrot.lane.b32.xlu2 %v806_v23, %s1639_s9  ;;  %s1336_s9 = scalar_lea.vmem (%p1703_p5), %s2176_s4, %s1481_s7 }
 0x3e7   : > { %1556 = vset.pattern.permute.xlu1 %v1638_v46 }
 0x3e8   : > { %902 = vperm.xlu2 %1555, %v1887_v55   ;;  %960 = vperm.xlu1 %1556, %v1882_v15   ;;  %v1456_v15 = vsel %vm807_vm15, 1.0, %v1637_v38 }
 0x3f0   : > { %1557 = vset.pattern.permute.xlu2 %v1638_v46  ;;  %1558 = vset.pattern.permute.xlu1 %v1630_v3 }
 0x3f1   : > { %964 = vperm.xlu2 %1557, %v1887_v55   ;;  %v1457_v55 = vsel %vm808_vm1, 1.0, %v1637_v38 }
 0x3f9   : > { %1559 = vset.pattern.permute.xlu2 %v1630_v3 }
 0x422   : > { %v820_v28 = vpop.permute.xlu2 %819 }
 0x42a   : > { %v824_v47 = vpop.permute.xlu2 %823 }
 0x42b   : > { %v828_v54 = vsel %vm827_vm4, %v820_v28, %v824_v47  ;;  %v830_v56 = vsel %vm827_vm4, %v824_v47, %v820_v28 }
 0x42c   : > { %v832_v1 = vmul.f32 %v1456_v15, %v830_v56  ;;  %v833_v4 = vmul.f32 %v1457_v55, %v828_v54 }
 0x42e   : > { %v873_v37 = vmul.f32 %v867_v22, %v832_v1  ;;  %v874_v31 = vmul.f32 %v867_v22, %v833_v4 }
 0x430   : > { %v878_v22 = vadd.f32 %v874_v31, %v862_v45  ;;  %v2050_v31 = vstv %s1466_s25 }
 0x432   : > { %v837_v50 = vpop.permute.xlu2 %836 }
 0x439   : > { %v822_v51 = vpop.permute.xlu1 %821  ;;  %v839_v10 = vpop.permute.xlu0 %838 }
 0x43a   : > { %v843_v3 = vpop.permute.xlu2 %842 }
 0x43b   : > { %v846_v59 = vsel %vm813_vm2, %v839_v10, %v843_v3  ;;  %v848_v60 = vsel %vm813_vm2, %v843_v3, %v839_v10 }
 0x43c   : > { %v851_v8 = vmul.f32 %v1458_v52, %v846_v59  ;;  %v852_v20 = vmul.f32 %v1459_v9, %v848_v60 }
 0x441   : > { %v826_v53 = vpop.permute.xlu1 %825  ;;  %v887_v6 = vpop.permute.xlu0 %886 }
 0x442   : > { %v829_v57 = vsel %vm827_vm4, %v822_v51, %v826_v53  ;;  %v831_v58 = vsel %vm827_vm4, %v826_v53, %v822_v51  ;;  %v891_v26 = vmul.f32 %v887_v6, %v851_v8  ;;  %v892_v33 = vmul.f32 %v887_v6, %v852_v20  ;;  %v903_v28 = vpop.permute.xlu2 %902 }
 0x443   : > { %v834_v61 = vmul.f32 %v1456_v15, %v831_v58  ;;  %v835_v62 = vmul.f32 %v1457_v55, %v829_v57  ;;  %vm1159_vm4 = vcmp.ge.s32.totalorder %v1827_v32, 4 }
 0x445   : > { %v875_v16 = vmul.f32 %v871_v48, %v834_v61  ;;  %v876_v5 = vmul.f32 %v871_v48, %v835_v62  ;;  %v877_v48 = vadd.f32 %v873_v37, %v861_v35  ;;  %v2024_v62 = vld [vmem:[%s2173_s1 + $0x28] sm:$0xff] }
 0x446   : > { %1140 = vperm.xlu2 %1559, %v2024_v62  }
 0x447   : > { %v879_v19 = vadd.f32 %v875_v16, %v863_v63  ;;  %v880_v25 = vadd.f32 %v876_v5, %v864_v0 }
 0x449   : > { %v841_v39 = vpop.permute.xlu1 %840  ;;  %v895_v29 = vadd.f32 %v891_v26, %v879_v19  ;;  %v896_v44 = vadd.f32 %v892_v33, %v880_v25 }
 0x44a   : > { %v845_v41 = vsel %vm813_vm2, %v837_v50, %v841_v39  ;;  %v847_v43 = vsel %vm813_vm2, %v841_v39, %v837_v50 }
 0x44b   : > { %v849_v34 = vmul.f32 %v1458_v52, %v845_v41  ;;  %v850_v23 = vmul.f32 %v1459_v9, %v847_v43  ;;  %v907_v51 = vadd.f32 %v903_v28, %v895_v29  ;;  %v908_v10 = vadd.f32 %v903_v28, %v896_v44  ;;  %v1452_v52 = vld [vmem:[%s2174_s2 + $0x18] sm:$0xff]  ;;  %v965_v16 = vpop.permute.xlu2 %964 }
 0x44d   : > { %v889_v30 = vmul.f32 %v883_v27, %v849_v34  ;;  %v890_v47 = vmul.f32 %v883_v27, %v850_v23  ;;  %v915_v50 = vmul.f32 %v907_v51, %v1913_v17  ;;  %v916_v53 = vmul.f32 %v908_v10, %v1913_v17  ;;  %v1451_v27 = vld [vmem:[%s2174_s2 + $0x10] sm:$0xff] }
 0x44e   : > { %vm911_vm5 = vcmp.ge.f32.partialorder %v907_v51, 0.0  ;;  %vm912_vm6 = vcmp.ge.f32.partialorder %v908_v10, 0.0  ;;  %v921_v61 = vpack.c.bf16 %v1452_v52, %v1451_v27  ;;  %1564 = vset.pattern.permute.xlu2 %v1632_v18 }
 0x44f   : > { %v893_v3 = vadd.f32 %v889_v30, %v877_v48  ;;  %v894_v15 = vadd.f32 %v890_v47, %v878_v22  ;;  %v919_v56 = vsel %vm911_vm5, %v907_v51, %v915_v50  ;;  %v920_v58 = vsel %vm912_vm6, %v908_v10, %v916_v53 }
 0x450   : > { %vm1160_vm5 = vcmp.ge.s32.totalorder %v1830_v36, 4  ;;  %vm1165_vm6 = vcmp.lt.s32.totalorder %v1827_v32, 124 }
 0x451   : > { %v899_v55 = vpop.permute.xlu1 %898 }
 0x452   : > { %v905_v54 = vadd.f32 %v899_v55, %v893_v3  ;;  %v906_v42 = vadd.f32 %v899_v55, %v894_v15 }
 0x454   : > { %v913_v13 = vmul.f32 %v905_v54, %v1913_v17  ;;  %v914_v49 = vmul.f32 %v906_v42, %v1913_v17  ;;  %vm909_vm7 = vcmp.ge.f32.partialorder %v905_v54, 0.0  ;;  %vm910_vm8 = vcmp.ge.f32.partialorder %v906_v42, 0.0  ;;  %v2019_v17 = vld [vmem:[%s2173_s1 + $0x20] sm:$0xff] }
 0x455   : > { %1135 = vperm.xlu1 %1558, %v2019_v17   ;;  %v978_v37 = vpack.c.bf16 %v2024_v62, %v2019_v17 }
 0x456   : > { %v917_v9 = vsel %vm909_vm7, %v905_v54, %v913_v13  ;;  %v918_v57 = vsel %vm910_vm8, %v906_v42, %v914_v49  ;;  %vm1166_vm7 = vcmp.lt.s32.totalorder %v1830_v36, 124  ;;  %vm1179_vm8 = vcmp.lt.s32.totalorder %v1827_v32, 4 }
 0x457   : > { %v922_v59 = vpack.c.bf16 %v919_v56, %v917_v9  ;;  %v923_v60 = vpack.c.bf16 %v920_v58, %v918_v57 }
 0x459   : > { %934 = vmatpush.bf16.msrb.mxu2 %v922_v59  ;;  %948 = vmatpush.bf16.msrb.mxu3 %v923_v60 }
 0x45a   : > { %v961_v6 = vpop.permute.xlu1 %960 }
 0x45c   : > { %1460 = vmatmul.msk.bf16.vlgmr.msrb.gmra.mxu2 %vm276_vm0, %v921_v61  ;;  %1461 = vmatmul.msk.bf16.vlgmr.msrb.gmra.mxu3 %vm276_vm0, %v921_v61 }
 0x45d   : > { %1561 = vset.pattern.permute.xlu1 %v1629_v24 }
 0x4df   : > { %v936_v63 = vpop.f32.mrf.mxu2  ;;  %v950_v0 = vpop.f32.mrf.mxu3 }
 0x4e0   : > { %v955_v1 = vadd.f32 %v936_v63, %v1897_v2  ;;  %v956_v4 = vadd.f32 %v950_v0, %v1899_v11 }
 0x4e2   : > { %v2034_v25 = vadd.f32 %v961_v6, %v955_v1  ;;  %v2036_v26 = vadd.f32 %v961_v6, %v956_v4 }
 0x4e7   : > { %v938_v5 = vpop.f32.mrf.mxu2  ;;  %v952_v8 = vpop.f32.mrf.mxu3 }
 0x4e8   : > { %v957_v20 = vadd.f32 %v938_v5, %v1901_v12  ;;  %v958_v19 = vadd.f32 %v952_v8, %v1903_v14 }
 0x4ea   : > { %v2038_v24 = vadd.f32 %v965_v16, %v957_v20  ;;  %v2040_v33 = vadd.f32 %v965_v16, %v958_v19 }
 0x4ec   : > { %v979_v2 = vpack.c.bf16 %v2038_v24, %v2034_v25  ;;  %v980_v11 = vpack.c.bf16 %v2040_v33, %v2036_v26 }
 0x4ee   : > { %991 = vmatpush.bf16.msra.mxu0 %v979_v2  ;;  %1005 = vmatpush.bf16.msra.mxu1 %v980_v11 }
 0x4f1   : > { %1467 = vmatmul.msk.bf16.vlgmr.msra.gmra.mxu0 %vm276_vm0, %v978_v37  ;;  %1468 = vmatmul.msk.bf16.vlgmr.msra.gmra.mxu1 %vm276_vm0, %v978_v37 }
 0x56e   : > { %v993_v12 = vpop.f32.mrf.mxu0  ;;  %v1007_v14 = vpop.f32.mrf.mxu1 }
 0x56f   : > { %v1017_v39 = vmul.f32 %v2050_v31, %v993_v12  ;;  %v1018_v41 = vmul.f32 %v2050_v31, %v1007_v14  ;;  %vm1012_vm9 = vcmp.ge.f32.partialorder %v993_v12, 0.0  ;;  %vm1013_vm10 = vcmp.ge.f32.partialorder %v1007_v14, 0.0 }
 0x571   : > { %v2054_v43 = vsel %vm1012_vm9, %v993_v12, %v1017_v39  ;;  %v2056_v29 = vsel %vm1013_vm10, %v1007_v14, %v1018_v41  ;;  %v2090_v41 = vpop.permute.xlu2 %1140 }
 0x572   : > { %v1039_v23 = vmul.f32 %v2054_v43, %v2054_v43  ;;  %v1040_v28 = vmul.f32 %v2056_v29, %v2056_v29 }
 0x576   : > { %v995_v44 = vpop.f32.mrf.mxu0  ;;  %v1009_v35 = vpop.f32.mrf.mxu1 }
 0x577   : > { %vm1014_vm11 = vcmp.ge.f32.partialorder %v995_v44, 0.0  ;;  %v1019_v45 = vmul.f32 %v2050_v31, %v995_v44  ;;  %vm1015_vm12 = vcmp.ge.f32.partialorder %v1009_v35, 0.0  ;;  %v1020_v34 = vmul.f32 %v2050_v31, %v1009_v35 }
 0x579   : > { %v2064_v30 = vsel %vm1014_vm11, %v995_v44, %v1019_v45  ;;  %v2066_v47 = vsel %vm1015_vm12, %v1009_v35, %v1020_v34  ;;  %v2092_v44 = vpop.permute.xlu1 %1135 }
 0x57a   : > { %v1025_v48 = vadd.f32 %v2064_v30, %v2054_v43  ;;  %v1041_v22 = vmul.f32 %v2064_v30, %v2064_v30  ;;  %v1032_v51 = vadd.f32 %v2066_v47, %v2056_v29  ;;  %v1042_v10 = vmul.f32 %v2066_v47, %v2066_v47 }
 0x57c   : > { %v1026_v3 = vrot.slane %v1025_v48, 4  ;;  %v1043_v15 = vadd.f32 %v1041_v22, %v1039_v23  ;;  %v1033_v55 = vrot.slane %v1032_v51, 4  ;;  %v1050_v50 = vadd.f32 %v1042_v10, %v1040_v28 }
 0x57e   : > { %v1027_v53 = vadd.f32 %v1026_v3, %v1025_v48  ;;  %v1044_v54 = vrot.slane %v1043_v15, 4  ;;  %v1034_v42 = vadd.f32 %v1033_v55, %v1032_v51  ;;  %v1051_v13 = vrot.slane %v1050_v50, 4 }
 0x580   : > { %v1028_v49 = vrot.slane %v1027_v53, 2  ;;  %v1052_v27 = vadd.f32 %v1051_v13, %v1050_v50  ;;  %v1035_v52 = vrot.slane %v1034_v42, 2  ;;  %v1045_v9 = vadd.f32 %v1044_v54, %v1043_v15 }
 0x582   : > { %v1029_v56 = vadd.f32 %v1028_v49, %v1027_v53  ;;  %v1036_v57 = vadd.f32 %v1035_v52, %v1034_v42  ;;  %v1046_v58 = vrot.slane %v1045_v9, 2  ;;  %v1053_v59 = vrot.slane %v1052_v27, 2 }
 0x584   : > { %v1030_v60 = vrot.slane %v1029_v56, 1  ;;  %v1037_v61 = vrot.slane %v1036_v57, 1  ;;  %v1047_v63 = vadd.f32 %v1046_v58, %v1045_v9  ;;  %v1054_v0 = vadd.f32 %v1053_v59, %v1052_v27 }
 0x586   : > { %v1031_v1 = vadd.f32 %v1030_v60, %v1029_v56  ;;  %v1038_v4 = vadd.f32 %v1037_v61, %v1036_v57  ;;  %v1048_v6 = vrot.slane %v1047_v63, 1  ;;  %v1055_v16 = vrot.slane %v1054_v0, 1 }
 0x588   : > { %v1091_v5 = vmul.f32 0.0, %v1031_v1  ;;  %v1058_v8 = vmul.f32 0.0, %v1038_v4  ;;  %v1056_v20 = vadd.f32 %v1055_v16, %v1054_v0  ;;  %v1049_v11 = vadd.f32 %v1048_v6, %v1047_v63 }
 0x58a   : > { %v1093_v19 = vadd.f32 %v1091_v5, %v1038_v4  ;;  %v1059_v2 = vadd.f32 %v1058_v8, %v1031_v1  ;;  %v1064_v37 = vmul.f32 0.0, %v1056_v20  ;;  %v1097_v14 = vmul.f32 0.0, %v1049_v11 }
 0x58c   : > { %1094 = vadd.xlane.f32.xlu1 %v1093_v19  ;;  %1060 = vadd.xlane.f32.xlu0 %v1059_v2  ;;  %v1065_v12 = vadd.f32 %v1064_v37, %v1049_v11  ;;  %v1099_v39 = vadd.f32 %v1097_v14, %v1056_v20 }
 0x58e   : > { %1066 = vadd.xlane.f32.xlu2 %v1065_v12 }
 0x594   : > { %1100 = vadd.xlane.f32.xlu0 %v1099_v39 }
 0x5a5   : > { %1152 = vperm.xlu1 %1561, %v2024_v62  }
 0x5a6   : > { %1218 = vperm.xlu2 %1564, %v2019_v17  }
 0x5a8   : > { %1148 = vperm.xlu0 %1560, %v2019_v17  }
 0x5ad   : > { %1563 = vset.pattern.permute.xlu1 %v1631_v7 }
 0x5ae   : > { %1210 = vperm.xlu1 %1563, %v2024_v62   ;;  %1566 = vset.pattern.permute.xlu2 %v1633_v21 }
 0x5af   : > { %1234 = vperm.xlu2 %1566, %v2019_v17  }
 0x5b0   : > { %1562 = vset.pattern.permute.xlu0 %v1631_v7 }
 0x5b1   : > { %1206 = vperm.xlu0 %1562, %v2019_v17  }
 0x5b6   : > { %1565 = vset.pattern.permute.xlu1 %v1632_v18 }
 0x5b7   : > { %1222 = vperm.xlu1 %1565, %v2024_v62   ;;  %1569 = vset.pattern.permute.xlu2 %v1634_v40 }
 0x5b9   : > { %1567 = vset.pattern.permute.xlu0 %v1633_v21 }
 0x5bf   : > { %1568 = vset.pattern.permute.xlu1 %v1634_v40 }
 0x5ff   : > { %v1061_v35 = vpop.xlane.xlu0 %1060  ;;  %v1095_v34 = vpop.xlane.xlu1 %1094 }
 0x600   : > { %v1062_v45 = vmul.f32 0.00048828125, %v1061_v35  ;;  %v1096_v48 = vmul.f32 0.00048828125, %v1095_v34 }
 0x601   : > { %v1067_v7 = vpop.xlane.xlu2 %1066 }
 0x602   : > { %v1069_v23 = vmul.f32 %v1062_v45, %v1062_v45  ;;  %v1068_v28 = vmul.f32 0.00048828125, %v1067_v7  ;;  %v1103_v3 = vmul.f32 %v1096_v48, %v1096_v48  ;;  %v1106_v56 = vmul.f32 0.0, %v1096_v48 }
 0x603   : > { %v1073_v59 = vmul.f32 0.0, %v1062_v45 }
 0x604   : > { %v1070_v18 = vsub.f32 %v1068_v28, %v1069_v23  ;;  %v1108_v61 = vadd.f32 %v1106_v56, %v1062_v45 }
 0x605   : > { %v1109_v4 = vadd.f32 %v1096_v48, %v1073_v59 }
 0x606   : > { %v1071_v22 = vmax.f32 %v1070_v18, 0.0  ;;  %v1125_v6 = vsub.f32 %v2054_v43, %v1108_v61  ;;  %v1127_v16 = vsub.f32 %v2064_v30, %v1108_v61 }
 0x607   : > { %v1101_v51 = vpop.xlane.xlu0 %1100  ;;  %v1128_v11 = vsub.f32 %v2066_v47, %v1109_v4  ;;  %v1126_v39 = vsub.f32 %v2056_v29, %v1109_v4 }
 0x608   : > { %v1076_v10 = vadd.f32 1e-05, %v1071_v22  ;;  %v1102_v15 = vmul.f32 0.00048828125, %v1101_v51 }
 0x609   : > { %v1219_v29 = vpop.permute.xlu2 %1218 }
 0x60a   : > { %1581 = vrsqrt.f32 %v1076_v10  ;;  %v1104_v21 = vsub.f32 %v1102_v15, %v1103_v3  ;;  %vm1083_vm15 = vweird.f32 %v1076_v10 }
 0x60c   : > { %v1105_v40 = vmax.f32 %v1104_v21, 0.0  ;;  %v1471_v21 = vsel %vm1165_vm6, 1.0, %v1637_v38 }
 0x60e   : > { %v1110_v55 = vadd.f32 1e-05, %v1105_v40  ;;  %v1472_v40 = vsel %vm1166_vm7, 1.0, %v1637_v38 }
 0x610   : > { %v1582_v50 = vpop.eup %1581  ;;  %1583 = vrsqrt.f32 %v1110_v55  ;;  %vm1117_vm2 = vweird.f32 %v1110_v55 }
 0x611   : > { %v1078_v53 = vmul.f32 %v1582_v50, %v1076_v10  ;;  %vm1084_vm13 = vweird.f32 %v1582_v50 }
 0x612   : > { %vm1085_vm1 = vmor %vm1083_vm15, %vm1084_vm13 }
 0x613   : > { %v1079_v54 = vmul.f32 %v1582_v50, %v1078_v53 }
 0x615   : > { %v1080_v42 = vmul.f32 0.5, %v1079_v54 }
 0x616   : > { %v1584_v13 = vpop.eup %1583 }
 0x617   : > { %v1112_v49 = vmul.f32 %v1584_v13, %v1110_v55  ;;  %v1081_v27 = vsub.f32 1.5, %v1080_v42  ;;  %vm1118_vm14 = vweird.f32 %v1584_v13  ;;  %v1153_v14 = vpop.permute.xlu1 %1152 }
 0x618   : > { %vm1119_vm3 = vmor %vm1117_vm2, %vm1118_vm14 }
 0x619   : > { %v1113_v52 = vmul.f32 %v1584_v13, %v1112_v49  ;;  %v1082_v57 = vmul.f32 %v1582_v50, %v1081_v27 }
 0x61a   : > { %v1149_v35 = vpop.permute.xlu0 %1148 }
 0x61b   : > { %v1114_v9 = vmul.f32 0.5, %v1113_v52  ;;  %v1086_v63 = vsel %vm1085_vm1, %v1582_v50, %v1082_v57 }
 0x61c   : > { %v1088_v5 = vmul.f32 0.0, %v1086_v63 }
 0x61d   : > { %v1115_v58 = vsub.f32 1.5, %v1114_v9 }
 0x61f   : > { %v1116_v60 = vmul.f32 %v1584_v13, %v1115_v58 }
 0x620   : > { %v1211_v48 = vpop.permute.xlu1 %1210 }
 0x621   : > { %v1120_v0 = vsel %vm1119_vm3, %v1584_v13, %v1116_v60 }
 0x622   : > { %v1121_v1 = vmul.f32 0.0, %v1120_v0  ;;  %v1124_v20 = vadd.f32 %v1120_v0, %v1088_v5 }
 0x623   : > { %v1207_v51 = vpop.permute.xlu0 %1206 }
 0x624   : > { %v1123_v8 = vadd.f32 %v1121_v1, %v1086_v63  ;;  %v1132_v45 = vmul.f32 %v1128_v11, %v1124_v20  ;;  %v1130_v30 = vmul.f32 %v1126_v39, %v1124_v20 }
 0x626   : > { %v1131_v19 = vmul.f32 %v1127_v16, %v1123_v8  ;;  %v1129_v2 = vmul.f32 %v1125_v6, %v1123_v8  ;;  %v1146_v47 = vmul.f32 %v2090_v41, %v1132_v45  ;;  %v1144_v7 = vmul.f32 %v2092_v44, %v1130_v30 }
 0x628   : > { %v1145_v37 = vmul.f32 %v2090_v41, %v1131_v19  ;;  %v1143_v12 = vmul.f32 %v2092_v44, %v1129_v2  ;;  %v1158_v23 = vadd.f32 %v1153_v14, %v1146_v47  ;;  %v2105_v28 = vadd.f32 %v1149_v35, %v1144_v7  ;;  %v1235_v41 = vpop.permute.xlu2 %1234 }
 0x629   : > { %v1223_v22 = vpop.permute.xlu1 %1222 }
 0x62a   : > { %v1157_v34 = vadd.f32 %v1153_v14, %v1145_v37  ;;  %v2100_v43 = vadd.f32 %v1149_v35, %v1143_v12  ;;  %v1216_v9 = vmul.f32 %v1211_v48, %v1158_v23  ;;  %v1214_v37 = vmul.f32 %v1207_v51, %v2105_v28 }
 0x62c   : > { %1190 = vrot.lane.b32.xlu0 %v1157_v34, %s1641_s26  ;;  %1173 = vrot.lane.b32.xlu1 %v1157_v34, %s1642_s27  ;;  %v1215_v52 = vmul.f32 %v1211_v48, %v1157_v34  ;;  %v1213_v11 = vmul.f32 %v1207_v51, %v2100_v43  ;;  %v1465_v51 = vld [vmem:[%s2174_s2 + $0x28] sm:$0xff] }
 0x62d   : > { %1171 = vrot.lane.b32.xlu2 %v2100_v43, %s1642_s27 }
 0x634   : > { %1238 = vperm.xlu0 %1567, %v2024_v62   ;;  %1177 = vrot.lane.b32.xlu1 %v1158_v23, %s1642_s27 }
 0x635   : > { %1175 = vrot.lane.b32.xlu2 %v2105_v28, %s1642_s27 }
 0x63c   : > { %1192 = vrot.lane.b32.xlu1 %v2105_v28, %s1641_s26  ;;  %1572 = vset.pattern.permute.xlu0 %v1638_v46 }
 0x63d   : > { %1188 = vrot.lane.b32.xlu2 %v2100_v43, %s1641_s26 }
 0x644   : > { %1250 = vperm.xlu1 %1568, %v2019_v17  }
 0x645   : > { %1194 = vrot.lane.b32.xlu2 %v1158_v23, %s1641_s26 }
 0x64c   : > { %1570 = vset.pattern.permute.xlu1 %v1638_v46 }
 0x64d   : > { %1254 = vperm.xlu2 %1569, %v2024_v62   ;;  %1312 = vperm.xlu1 %1570, %v2019_v17   ;;  %v1469_v17 = vsel %vm1159_vm4, 1.0, %v1637_v38 }
 0x655   : > { %1571 = vset.pattern.permute.xlu2 %v1638_v46 }
 0x656   : > { %1316 = vperm.xlu2 %1571, %v2024_v62   ;;  %v1470_v62 = vsel %vm1160_vm5, 1.0, %v1637_v38 }
 0x687   : > { %v1172_v44 = vpop.permute.xlu2 %1171 }
 0x68f   : > { %v1176_v18 = vpop.permute.xlu2 %1175 }
 0x690   : > { %v1180_v50 = vsel %vm1179_vm8, %v1172_v44, %v1176_v18  ;;  %v1182_v53 = vsel %vm1179_vm8, %v1176_v18, %v1172_v44 }
 0x691   : > { %v1184_v56 = vmul.f32 %v1469_v17, %v1182_v53  ;;  %v1185_v57 = vmul.f32 %v1470_v62, %v1180_v50 }
 0x693   : > { %v1225_v6 = vmul.f32 %v1219_v29, %v1184_v56  ;;  %v1226_v16 = vmul.f32 %v1219_v29, %v1185_v57 }
 0x695   : > { %v1229_v34 = vadd.f32 %v1225_v6, %v1213_v11  ;;  %v1230_v30 = vadd.f32 %v1226_v16, %v1214_v37 }
 0x697   : > { %v1189_v10 = vpop.permute.xlu2 %1188 }
 0x69e   : > { %v1174_v3 = vpop.permute.xlu1 %1173  ;;  %v1191_v15 = vpop.permute.xlu0 %1190 }
 0x69f   : > { %v1195_v46 = vpop.permute.xlu2 %1194 }
 0x6a0   : > { %v1198_v36 = vsel %vm1165_vm6, %v1191_v15, %v1195_v46  ;;  %v1200_v13 = vsel %vm1165_vm6, %v1195_v46, %v1191_v15 }
 0x6a1   : > { %v1203_v60 = vmul.f32 %v1471_v21, %v1198_v36  ;;  %v1204_v61 = vmul.f32 %v1472_v40, %v1200_v13 }
 0x6a6   : > { %v1178_v55 = vpop.permute.xlu1 %1177  ;;  %v1239_v58 = vpop.permute.xlu0 %1238 }
 0x6a7   : > { %v1181_v54 = vsel %vm1179_vm8, %v1174_v3, %v1178_v55  ;;  %v1183_v42 = vsel %vm1179_vm8, %v1178_v55, %v1174_v3  ;;  %v1243_v1 = vmul.f32 %v1239_v58, %v1203_v60  ;;  %v1244_v4 = vmul.f32 %v1239_v58, %v1204_v61  ;;  %v1255_v39 = vpop.permute.xlu2 %1254 }
 0x6a8   : > { %v1186_v49 = vmul.f32 %v1469_v17, %v1183_v42  ;;  %v1187_v27 = vmul.f32 %v1470_v62, %v1181_v54 }
 0x6aa   : > { %v1227_v59 = vmul.f32 %v1223_v22, %v1186_v49  ;;  %v1228_v38 = vmul.f32 %v1223_v22, %v1187_v27  ;;  %v1464_v22 = vld [vmem:[%s2174_s2 + $0x20] sm:$0xff] }
 0x6ac   : > { %v1231_v63 = vadd.f32 %v1227_v59, %v1215_v52  ;;  %v1232_v0 = vadd.f32 %v1228_v38, %v1216_v9 }
 0x6ae   : > { %v1193_v5 = vpop.permute.xlu1 %1192  ;;  %v1247_v19 = vadd.f32 %v1243_v1, %v1231_v63  ;;  %v1248_v2 = vadd.f32 %v1244_v4, %v1232_v0 }
 0x6af   : > { %v1197_v8 = vsel %vm1165_vm6, %v1189_v10, %v1193_v5  ;;  %v1199_v20 = vsel %vm1165_vm6, %v1193_v5, %v1189_v10 }
 0x6b0   : > { %v1201_v12 = vmul.f32 %v1471_v21, %v1197_v8  ;;  %v1202_v14 = vmul.f32 %v1472_v40, %v1199_v20  ;;  %v1259_v47 = vadd.f32 %v1255_v39, %v1247_v19  ;;  %v1260_v7 = vadd.f32 %v1255_v39, %v1248_v2  ;;  %v1317_v36 = vpop.permute.xlu2 %1316 }
 0x6b1   : > { %v1273_v21 = vpack.c.bf16 %v1465_v51, %v1464_v22 }
 0x6b2   : > { %v1241_v35 = vmul.f32 %v1235_v41, %v1201_v12  ;;  %v1242_v45 = vmul.f32 %v1235_v41, %v1202_v14  ;;  %v1267_v32 = vmul.f32 %v1259_v47, %v2050_v31  ;;  %v1268_v48 = vmul.f32 %v1260_v7, %v2050_v31 }
 0x6b3   : > { %vm1263_vm9 = vcmp.ge.f32.partialorder %v1259_v47, 0.0  ;;  %vm1264_vm10 = vcmp.ge.f32.partialorder %v1260_v7, 0.0 }
 0x6b4   : > { %v1245_v23 = vadd.f32 %v1241_v35, %v1229_v34  ;;  %v1246_v29 = vadd.f32 %v1242_v45, %v1230_v30  ;;  %v1271_v10 = vsel %vm1263_vm9, %v1259_v47, %v1267_v32  ;;  %v1272_v3 = vsel %vm1264_vm10, %v1260_v7, %v1268_v48 }
 0x6b6   : > { %v1251_v44 = vpop.permute.xlu1 %1250 }
 0x6b7   : > { %v1257_v18 = vadd.f32 %v1251_v44, %v1245_v23  ;;  %v1258_v43 = vadd.f32 %v1251_v44, %v1246_v29 }
 0x6b9   : > { %vm1261_vm11 = vcmp.ge.f32.partialorder %v1257_v18, 0.0  ;;  %vm1262_vm12 = vcmp.ge.f32.partialorder %v1258_v43, 0.0  ;;  %v1265_v28 = vmul.f32 %v1257_v18, %v2050_v31  ;;  %v1266_v41 = vmul.f32 %v1258_v43, %v2050_v31 }
 0x6bb   : > { %v1269_v15 = vsel %vm1261_vm11, %v1257_v18, %v1265_v28  ;;  %v1270_v46 = vsel %vm1262_vm12, %v1258_v43, %v1266_v41 }
 0x6bc   : > { %v1274_v17 = vpack.c.bf16 %v1271_v10, %v1269_v15  ;;  %v1275_v62 = vpack.c.bf16 %v1272_v3, %v1270_v46 }
 0x6be   : > { %1286 = vmatpush.bf16.msra.mxu2 %v1274_v17  ;;  %1300 = vmatpush.bf16.msra.mxu3 %v1275_v62 }
 0x6bf   : > { %v1313_v31 = vpop.permute.xlu1 %1312 }
 0x6c1   : > { %1473 = vmatmul.msk.bf16.vlgmr.msra.gmra.mxu2 %vm276_vm0, %v1273_v21  ;;  %1474 = vmatmul.msk.bf16.vlgmr.msra.gmra.mxu3 %vm276_vm0, %v1273_v21 }
 0x744   : > { %v1288_v40 = vpop.f32.mrf.mxu2  ;;  %v1302_v55 = vpop.f32.mrf.mxu3 }
 0x745   : > { %v1307_v50 = vadd.f32 %v1288_v40, %v2034_v25  ;;  %v1308_v53 = vadd.f32 %v1302_v55, %v2036_v26 }
 0x747   : > { %v1319_v54 = vadd.f32 %v1313_v31, %v1307_v50  ;;  %v1320_v42 = vadd.f32 %v1313_v31, %v1308_v53 }
 0x749   : > { %1323 = vst [vmem:[%s231_s6] sm:$0xff] %v1319_v54 }
 0x74a   : > { %1324 = vst [vmem:[%s231_s6 + $0x8] sm:$0xff] %v1320_v42 }
 0x74c   : > { %v1290_v13 = vpop.f32.mrf.mxu2  ;;  %v1304_v49 = vpop.f32.mrf.mxu3 }
 0x74d   : > { %v1309_v27 = vadd.f32 %v1290_v13, %v2038_v24  ;;  %v1310_v52 = vadd.f32 %v1304_v49, %v2040_v33 }
 0x74e   : > { %1333 = sbr.rel (!%p1703_p5) target bundleno = 1883 (0x75b), region = 67 }
 0x74f   : > { %v1321_v9 = vadd.f32 %v1317_v36, %v1309_v27  ;;  %v1322_v56 = vadd.f32 %v1317_v36, %v1310_v52 }
 0x750   : > { %v1349_v25 = vld [vmem:[%s231_s6] sm:$0xff] (%p1703_p5) }
 0x751   : > { %1325 = vst [vmem:[%s231_s6 + $0x10] sm:$0xff] %v1321_v9  ;;  %v1351_v26 = vld [vmem:[%s231_s6 + $0x8] sm:$0xff] (%p1703_p5) }
 0x752   : > { %1326 = vst [vmem:[%s231_s6 + $0x18] sm:$0xff] %v1322_v56 }
 0x753   : > { %1350 = vst [vmem:[%s1336_s9] sm:$0xff] %v1349_v25 }
 0x754   : > { %1352 = vst [vmem:[%s1336_s9 + $0x8] sm:$0xff] %v1351_v26 }
 0x758   : > { %v1353_v57 = vld [vmem:[%s231_s6 + $0x10] sm:$0xff] }
 0x759   : > { %v1355_v24 = vld [vmem:[%s231_s6 + $0x18] sm:$0xff]  ;;  %1354 = vst [vmem:[%s1336_s9 + $0x20] sm:$0xff] %v1353_v57 }
 0x75a   : > { %1356 = vst [vmem:[%s1336_s9 + $0x28] sm:$0xff] %v1355_v24 }
 0x75b PF: > { %p12_p13 = scmp.ge.s32.totalorder %s1687_s19, 4   ;;  %s2180_s15 = smov %s1622_s16 }
 0x75c   : > { %s2181_s16 = smov %s1697_s22  ;;  %s2182_s17 = smov %s1687_s19 }
 0x75d   :  { %14 = sbr.rel (!%p12_p13) target bundleno = 2 (0x2), region = 126 }
 0x762   :  { %1372 = vsyncpa [#allocation4], 1 }
 0x763   :  { %1374 = vsyncpa [#allocation4 + $0x1], 1 }

</bundles_post_ra>
